<compile_context>
chip_gen: v7x
topology: tpu7x:2x2x1
jax: 0.10.0
libtpu: 0.0.40
codegen_flags: <defaults>
</compile_context>

<pallas_src>
import jax
import jax.numpy as jnp
from jax.experimental import pallas as pl
from jax.experimental.pallas import tpu as pltpu


_FC2_DIMS = [(64, 512), (512, 256), (256, 64)]    # FC(64, 64, 3)
_LIN_DIMS = [(64, 512), (512, 256), (256, 128)]   # FC(64, 128, 3)
_BN_EPS = 1e-5


# ------------------------------ Pallas kernel -------------------------------

def genenet_kernel(x_ref,
                   w1_ref, b1_ref,
                   wa1_ref, ba1_ref, wa2_ref, ba2_ref, wa3_ref, ba3_ref,
                   s3_ref, t3_ref,
                   wb1_ref, bb1_ref, wb2_ref, bb2_ref, wb3_ref, bb3_ref,
                   w2_ref, b2_ref,
                   out_ref):
    """Whole GeneNet forward for one batch tile of tb rows."""

    def lin(h, w_ref, b_ref):
        # bf16 MXU matmul with f32 accumulation; bias add stays f32.
        return jnp.dot(h.astype(jnp.bfloat16), w_ref[...],
                       preferred_element_type=jnp.float32) + b_ref[...]

    # fc1: Linear(13 -> 64) (input zero-padded to 16 features in the wrapper).
    # TODO(synk): embedding_dropout (p=0.5) is identity in eval mode; the
    # training-mode stochastic mask is not implemented.
    h = lin(x_ref[...], w1_ref, b1_ref)

    # fc2: 64 -> 512 -> 256 -> 64.  BN of blocks 1 & 2 pre-folded into the
    # next block's weights; block 3's BN is applied explicitly (=> x_fe).
    h = jnp.maximum(lin(h, wa1_ref, ba1_ref), 0.0)
    h = jnp.maximum(lin(h, wa2_ref, ba2_ref), 0.0)
    h = jnp.maximum(lin(h, wa3_ref, ba3_ref), 0.0)
    x_fe = h * s3_ref[...] + t3_ref[...]

    # lin: 64 -> 512 -> 256 -> 128.  BN folded forward; the last block's BN is
    # folded into lin2's weights/bias.
    h = jnp.maximum(lin(x_fe, wb1_ref, bb1_ref), 0.0)
    h = jnp.maximum(lin(h, wb2_ref, bb2_ref), 0.0)
    h = jnp.maximum(lin(h, wb3_ref, bb3_ref), 0.0)

    # lin2: Linear(128 -> 1) as a VPU multiply + lane reduction
    # (avoids a 1-lane-wide MXU push and a 1-lane masked store).
    risk = jnp.sum(h * w2_ref[...], axis=-1, keepdims=True) + b2_ref[...]

    # Lane-dense packed (tb, 128) output block: [:, :64] = x_fe,
    # [:, 64:] = risk broadcast (wrapper reads column 64).
    out_ref[:, :64] = x_fe
    out_ref[:, 64:] = jnp.broadcast_to(risk, x_fe.shape)


# --------------------------------- wrapper -----------------------------------

def _ceil_to(v, m):
    return -(-v // m) * m


def genenet_forward(params, x, *, batch_tile=256):
    """Fused GeneNet forward.

    params: kernel-ready flat tuple from fold_params().
    x: (B, 13) float32.
    Returns (risk (B, 1), x_fe (B, 64)) -- same order as GeneNet.forward.
    batch_tile: 256 suits v6e/v7x (256-wide MXU); use 128 on v5e.
    """
    B, F = x.shape
    assert F == 13, F
    x = x.astype(jnp.float32)
    x = jnp.pad(x, ((0, 0), (0, 16 - F)))        # 13 -> 16 feature pad

    # Batch tiling: sublane (8-row) aligned; prefer >= 2 grid steps so v7x's
    # two TensorCores both get work ("parallel" grid axis).
    b8 = _ceil_to(B, 8)
    tb = min(batch_tile, b8)
    num_tiles = -(-b8 // tb)
    if num_tiles == 1 and b8 >= 16:
        num_tiles = 2
    tb = _ceil_to(-(-B // num_tiles), 8)
    bp = num_tiles * tb
    if bp != B:
        # Padded rows produce garbage activations; they are sliced off below
        # and must never be consumed.
        x = jnp.pad(x, ((0, bp - B), (0, 0)))

    # Full-array blocks with a constant index_map -> weights stay
    # VMEM-resident across all batch-tile grid steps (~0.8 MB in bf16).
    in_specs = [pl.BlockSpec((tb, 16), lambda i: (i, 0))]
    in_specs += [pl.BlockSpec(p.shape, lambda i: (0, 0)) for p in params]

    out = pl.pallas_call(
        genenet_kernel,
        out_shape=jax.ShapeDtypeStruct((bp, 128), jnp.float32),
        grid=(num_tiles,),
        in_specs=in_specs,
        out_specs=pl.BlockSpec((tb, 128), lambda i: (i, 0)),
        compiler_params=pltpu.CompilerParams(
            dimension_semantics=("parallel",)),   # megacore-shard batch tiles
    )(x, *params)

    x_fe = out[:B, :64]
    risk = out[:B, 64:65]
    return risk, x_fe


# ----------------------------- parameter handling -----------------------------

def init_params(key):
    """PyTorch-layout parameters (eval-mode BatchNorm running stats)."""

    def linear(k, fi, fo):
        kw, kb = jax.random.split(k)
        lim = float(fi) ** -0.5
        w = jax.random.uniform(kw, (fi, fo), jnp.float32, -lim, lim)
        b = jax.random.uniform(kb, (1, fo), jnp.float32, -lim, lim)
        return w, b

    def bn(k, n):
        k1, k2, k3, k4 = jax.random.split(k, 4)
        return dict(
            gamma=1.0 + 0.05 * jax.random.normal(k1, (1, n), jnp.float32),
            beta=0.05 * jax.random.normal(k2, (1, n), jnp.float32),
            mean=0.1 * jax.random.normal(k3, (1, n), jnp.float32),
            var=0.5 + jax.random.uniform(k4, (1, n), jnp.float32))

    keys = iter(jax.random.split(key, 16))
    raw = {"fc1": linear(next(keys), 13, 64)}
    raw["fc2"] = [(*linear(next(keys), fi, fo), bn(next(keys), fo))
                  for (fi, fo) in _FC2_DIMS]
    raw["lin"] = [(*linear(next(keys), fi, fo), bn(next(keys), fo))
                  for (fi, fo) in _LIN_DIMS]
    raw["lin2"] = linear(next(keys), 128, 1)
    return raw


def fold_params(raw):
    """PyTorch-layout params -> kernel-ready flat tuple.

    Eval-mode BN becomes per-channel (scale, shift); every hidden block's BN
    is folded into the NEXT Linear's weights/bias (exact modulo float assoc.).
    Matmul weights are cast to bf16; f32 accumulation happens in the kernel.
    """

    def bn_scale_shift(p):
        s = p["gamma"] * jax.lax.rsqrt(p["var"] + _BN_EPS)
        return s, p["beta"] - p["mean"] * s

    def fold_into_next(w, b, s_prev, t_prev):
        # (a * s + t) @ W + b  ==  a @ (s^T * W) + (t @ W + b)
        return s_prev.reshape(-1, 1) * w, b + t_prev @ w

    def fold_fc(blocks):
        (w0, b0, bn0), (w1, b1, bn1), (w2, b2, bn2) = blocks
        s0, t0 = bn_scale_shift(bn0)
        s1, t1 = bn_scale_shift(bn1)
        s2, t2 = bn_scale_shift(bn2)
        w1f, b1f = fold_into_next(w1, b1, s0, t0)
        w2f, b2f = fold_into_next(w2, b2, s1, t1)
        return [(w0, b0), (w1f, b1f), (w2f, b2f)], (s2, t2)

    params = []
    w1, b1 = raw["fc1"]
    w1 = jnp.pad(w1, ((0, 16 - w1.shape[0]), (0, 0)))    # 13 -> 16 row pad
    params += [w1.astype(jnp.bfloat16), b1]

    fc2_lins, (s_fe, t_fe) = fold_fc(raw["fc2"])
    for w, b in fc2_lins:
        params += [w.astype(jnp.bfloat16), b]
    params += [s_fe, t_fe]                                # explicit BN -> x_fe

    lin_lins, (s_last, t_last) = fold_fc(raw["lin"])
    for w, b in lin_lins:
        params += [w.astype(jnp.bfloat16), b]

    w2, b2 = raw["lin2"]                                  # (128, 1), (1, 1)
    w2_row = s_last * w2.reshape(1, -1)                   # fold last BN into lin2
    b2_f = b2 + t_last @ w2
    params += [w2_row.astype(jnp.float32), b2_f]
    return tuple(params)


def genenet_reference(raw, x):
    """Pure-jnp f32 reference (eval mode) mirroring the PyTorch forward."""

    def bn_apply(h, p):
        s = p["gamma"] * jax.lax.rsqrt(p["var"] + _BN_EPS)
        return (h - p["mean"]) * s + p["beta"]

    h = x @ raw["fc1"][0] + raw["fc1"][1]                 # fc1 (+ eval dropout)
    for (w, b, p) in raw["fc2"]:
        h = bn_apply(jnp.maximum(h @ w + b, 0.0), p)
    x_fe = h
    for (w, b, p) in raw["lin"]:
        h = bn_apply(jnp.maximum(h @ w + b, 0.0), p)
    risk = h @ raw["lin2"][0] + raw["lin2"][1]
    return risk, x_fe


# ----------------------------------- main -------------------------------------

if __name__ == "__main__":
    key = jax.random.PRNGKey(0)
    kp, kx = jax.random.split(key)
    B = 8

    raw = init_params(kp)
    params = fold_params(raw)
    x = jax.random.normal(kx, (B, 13), jnp.float32)

    fwd = jax.jit(genenet_forward)
    risk, x_fe = fwd(params, x)
    jax.block_until_ready((risk, x_fe))

    assert risk.shape == (B, 1), risk.shape
    assert x_fe.shape == (B, 64), x_fe.shape
    assert bool(jnp.all(jnp.isfinite(risk))) and bool(jnp.all(jnp.isfinite(x_fe)))

    # Sanity-check against a pure-jnp f32 reference (bf16-matmul tolerance).
    risk_ref, x_fe_ref = genenet_reference(raw, x)
    assert bool(jnp.allclose(risk, risk_ref, atol=1e-1, rtol=1e-1)), (
        float(jnp.max(jnp.abs(risk - risk_ref))))
    assert bool(jnp.allclose(x_fe, x_fe_ref, atol=1e-1, rtol=1e-1)), (
        float(jnp.max(jnp.abs(x_fe - x_fe_ref))))

    print("KERNEL_OK")
</pallas_src>

<mosaic_0001>
module attributes {stable_mosaic.version = 11 : i64} {
  func.func @genenet_kernel(%arg0: i32, %arg1: memref<8x16xf32, #tpu.memory_space<vmem>>, %arg2: memref<16x64xbf16, #tpu.memory_space<vmem>>, %arg3: memref<1x64xf32, #tpu.memory_space<vmem>>, %arg4: memref<64x512xbf16, #tpu.memory_space<vmem>>, %arg5: memref<1x512xf32, #tpu.memory_space<vmem>>, %arg6: memref<512x256xbf16, #tpu.memory_space<vmem>>, %arg7: memref<1x256xf32, #tpu.memory_space<vmem>>, %arg8: memref<256x64xbf16, #tpu.memory_space<vmem>>, %arg9: memref<1x64xf32, #tpu.memory_space<vmem>>, %arg10: memref<1x64xf32, #tpu.memory_space<vmem>>, %arg11: memref<1x64xf32, #tpu.memory_space<vmem>>, %arg12: memref<64x512xbf16, #tpu.memory_space<vmem>>, %arg13: memref<1x512xf32, #tpu.memory_space<vmem>>, %arg14: memref<512x256xbf16, #tpu.memory_space<vmem>>, %arg15: memref<1x256xf32, #tpu.memory_space<vmem>>, %arg16: memref<256x128xbf16, #tpu.memory_space<vmem>>, %arg17: memref<1x128xf32, #tpu.memory_space<vmem>>, %arg18: memref<1x128xf32, #tpu.memory_space<vmem>>, %arg19: memref<1x1xf32, #tpu.memory_space<vmem>>, %arg20: memref<8x128xf32, #tpu.memory_space<vmem>>) attributes {dimension_semantics = [#tpu.dimension_semantics<parallel>], iteration_bounds = array<i64: 1>, scalar_prefetch = 0 : i64, scratch_operands = 0 : i64, tpu.core_type = #tpu.core_type<tc>, window_params = [{transform_indices = @transform_0, window_bounds = array<i64: 8, 16>}, {pipeline_mode = #tpu.pipeline_mode<synchronous>, transform_indices = @transform_1, window_bounds = array<i64: 16, 64>}, {pipeline_mode = #tpu.pipeline_mode<synchronous>, transform_indices = @transform_2, window_bounds = array<i64: 1, 64>}, {pipeline_mode = #tpu.pipeline_mode<synchronous>, transform_indices = @transform_3, window_bounds = array<i64: 64, 512>}, {pipeline_mode = #tpu.pipeline_mode<synchronous>, transform_indices = @transform_4, window_bounds = array<i64: 1, 512>}, {pipeline_mode = #tpu.pipeline_mode<synchronous>, transform_indices = @transform_5, window_bounds = array<i64: 512, 256>}, {pipeline_mode = #tpu.pipeline_mode<synchronous>, transform_indices = @transform_6, window_bounds = array<i64: 1, 256>}, {pipeline_mode = #tpu.pipeline_mode<synchronous>, transform_indices = @transform_7, window_bounds = array<i64: 256, 64>}, {pipeline_mode = #tpu.pipeline_mode<synchronous>, transform_indices = @transform_8, window_bounds = array<i64: 1, 64>}, {pipeline_mode = #tpu.pipeline_mode<synchronous>, transform_indices = @transform_9, window_bounds = array<i64: 1, 64>}, {pipeline_mode = #tpu.pipeline_mode<synchronous>, transform_indices = @transform_10, window_bounds = array<i64: 1, 64>}, {pipeline_mode = #tpu.pipeline_mode<synchronous>, transform_indices = @transform_11, window_bounds = array<i64: 64, 512>}, {pipeline_mode = #tpu.pipeline_mode<synchronous>, transform_indices = @transform_12, window_bounds = array<i64: 1, 512>}, {pipeline_mode = #tpu.pipeline_mode<synchronous>, transform_indices = @transform_13, window_bounds = array<i64: 512, 256>}, {pipeline_mode = #tpu.pipeline_mode<synchronous>, transform_indices = @transform_14, window_bounds = array<i64: 1, 256>}, {pipeline_mode = #tpu.pipeline_mode<synchronous>, transform_indices = @transform_15, window_bounds = array<i64: 256, 128>}, {pipeline_mode = #tpu.pipeline_mode<synchronous>, transform_indices = @transform_16, window_bounds = array<i64: 1, 128>}, {pipeline_mode = #tpu.pipeline_mode<synchronous>, transform_indices = @transform_17, window_bounds = array<i64: 1, 128>}, {pipeline_mode = #tpu.pipeline_mode<synchronous>, transform_indices = @transform_18, window_bounds = array<i64: 1, 1>}, {transform_indices = @transform_19, window_bounds = array<i64: 8, 128>}]} {
    %c0 = arith.constant 0 : index
    %c0_0 = arith.constant 0 : index
    %0 = vector.load %arg1[%c0, %c0_0] : memref<8x16xf32, #tpu.memory_space<vmem>>, vector<8x16xf32>
    %1 = arith.truncf %0 : vector<8x16xf32> to vector<8x16xbf16>
    %c0_1 = arith.constant 0 : index
    %c0_2 = arith.constant 0 : index
    %2 = vector.load %arg2[%c0_1, %c0_2] : memref<16x64xbf16, #tpu.memory_space<vmem>>, vector<16x64xbf16>
    %cst = arith.constant dense<0.000000e+00> : vector<8x64xf32>
    %3 = tpu.matmul %1, %2, %cst {dimension_numbers = #tpu.dot_dimension_numbers<[1], [0], [0], [1], [0, 0, 1, 1], [], []>} : vector<8x16xbf16>, vector<16x64xbf16>, vector<8x64xf32> -> vector<8x64xf32>
    %c0_3 = arith.constant 0 : index
    %c0_4 = arith.constant 0 : index
    %4 = vector.load %arg3[%c0_3, %c0_4] : memref<1x64xf32, #tpu.memory_space<vmem>>, vector<1x64xf32>
    %5 = vector.broadcast %4 : vector<1x64xf32> to vector<8x64xf32>
    %6 = arith.addf %3, %5 : vector<8x64xf32>
    %7 = arith.truncf %6 : vector<8x64xf32> to vector<8x64xbf16>
    %c0_5 = arith.constant 0 : index
    %c0_6 = arith.constant 0 : index
    %8 = vector.load %arg4[%c0_5, %c0_6] : memref<64x512xbf16, #tpu.memory_space<vmem>>, vector<64x512xbf16>
    %cst_7 = arith.constant dense<0.000000e+00> : vector<8x512xf32>
    %9 = tpu.matmul %7, %8, %cst_7 {dimension_numbers = #tpu.dot_dimension_numbers<[1], [0], [0], [1], [0, 0, 1, 1], [], []>} : vector<8x64xbf16>, vector<64x512xbf16>, vector<8x512xf32> -> vector<8x512xf32>
    %c0_8 = arith.constant 0 : index
    %c0_9 = arith.constant 0 : index
    %10 = vector.load %arg5[%c0_8, %c0_9] : memref<1x512xf32, #tpu.memory_space<vmem>>, vector<1x512xf32>
    %11 = vector.broadcast %10 : vector<1x512xf32> to vector<8x512xf32>
    %12 = arith.addf %9, %11 : vector<8x512xf32>
    %cst_10 = arith.constant 0.000000e+00 : f32
    %13 = vector.broadcast %cst_10 : f32 to vector<8x512xf32>
    %14 = arith.maximumf %12, %13 : vector<8x512xf32>
    %15 = arith.truncf %14 : vector<8x512xf32> to vector<8x512xbf16>
    %c0_11 = arith.constant 0 : index
    %c0_12 = arith.constant 0 : index
    %16 = vector.load %arg6[%c0_11, %c0_12] : memref<512x256xbf16, #tpu.memory_space<vmem>>, vector<512x256xbf16>
    %cst_13 = arith.constant dense<0.000000e+00> : vector<8x256xf32>
    %17 = tpu.matmul %15, %16, %cst_13 {dimension_numbers = #tpu.dot_dimension_numbers<[1], [0], [0], [1], [0, 0, 1, 1], [], []>} : vector<8x512xbf16>, vector<512x256xbf16>, vector<8x256xf32> -> vector<8x256xf32>
    %c0_14 = arith.constant 0 : index
    %c0_15 = arith.constant 0 : index
    %18 = vector.load %arg7[%c0_14, %c0_15] : memref<1x256xf32, #tpu.memory_space<vmem>>, vector<1x256xf32>
    %19 = vector.broadcast %18 : vector<1x256xf32> to vector<8x256xf32>
    %20 = arith.addf %17, %19 : vector<8x256xf32>
    %cst_16 = arith.constant 0.000000e+00 : f32
    %21 = vector.broadcast %cst_16 : f32 to vector<8x256xf32>
    %22 = arith.maximumf %20, %21 : vector<8x256xf32>
    %23 = arith.truncf %22 : vector<8x256xf32> to vector<8x256xbf16>
    %c0_17 = arith.constant 0 : index
    %c0_18 = arith.constant 0 : index
    %24 = vector.load %arg8[%c0_17, %c0_18] : memref<256x64xbf16, #tpu.memory_space<vmem>>, vector<256x64xbf16>
    %cst_19 = arith.constant dense<0.000000e+00> : vector<8x64xf32>
    %25 = tpu.matmul %23, %24, %cst_19 {dimension_numbers = #tpu.dot_dimension_numbers<[1], [0], [0], [1], [0, 0, 1, 1], [], []>} : vector<8x256xbf16>, vector<256x64xbf16>, vector<8x64xf32> -> vector<8x64xf32>
    %c0_20 = arith.constant 0 : index
    %c0_21 = arith.constant 0 : index
    %26 = vector.load %arg9[%c0_20, %c0_21] : memref<1x64xf32, #tpu.memory_space<vmem>>, vector<1x64xf32>
    %27 = vector.broadcast %26 : vector<1x64xf32> to vector<8x64xf32>
    %28 = arith.addf %25, %27 : vector<8x64xf32>
    %cst_22 = arith.constant 0.000000e+00 : f32
    %29 = vector.broadcast %cst_22 : f32 to vector<8x64xf32>
    %30 = arith.maximumf %28, %29 : vector<8x64xf32>
    %c0_23 = arith.constant 0 : index
    %c0_24 = arith.constant 0 : index
    %31 = vector.load %arg10[%c0_23, %c0_24] : memref<1x64xf32, #tpu.memory_space<vmem>>, vector<1x64xf32>
    %32 = vector.broadcast %31 : vector<1x64xf32> to vector<8x64xf32>
    %33 = arith.mulf %30, %32 : vector<8x64xf32>
    %c0_25 = arith.constant 0 : index
    %c0_26 = arith.constant 0 : index
    %34 = vector.load %arg11[%c0_25, %c0_26] : memref<1x64xf32, #tpu.memory_space<vmem>>, vector<1x64xf32>
    %35 = vector.broadcast %34 : vector<1x64xf32> to vector<8x64xf32>
    %36 = arith.addf %33, %35 : vector<8x64xf32>
    %37 = arith.truncf %36 : vector<8x64xf32> to vector<8x64xbf16>
    %c0_27 = arith.constant 0 : index
    %c0_28 = arith.constant 0 : index
    %38 = vector.load %arg12[%c0_27, %c0_28] : memref<64x512xbf16, #tpu.memory_space<vmem>>, vector<64x512xbf16>
    %cst_29 = arith.constant dense<0.000000e+00> : vector<8x512xf32>
    %39 = tpu.matmul %37, %38, %cst_29 {dimension_numbers = #tpu.dot_dimension_numbers<[1], [0], [0], [1], [0, 0, 1, 1], [], []>} : vector<8x64xbf16>, vector<64x512xbf16>, vector<8x512xf32> -> vector<8x512xf32>
    %c0_30 = arith.constant 0 : index
    %c0_31 = arith.constant 0 : index
    %40 = vector.load %arg13[%c0_30, %c0_31] : memref<1x512xf32, #tpu.memory_space<vmem>>, vector<1x512xf32>
    %41 = vector.broadcast %40 : vector<1x512xf32> to vector<8x512xf32>
    %42 = arith.addf %39, %41 : vector<8x512xf32>
    %cst_32 = arith.constant 0.000000e+00 : f32
    %43 = vector.broadcast %cst_32 : f32 to vector<8x512xf32>
    %44 = arith.maximumf %42, %43 : vector<8x512xf32>
    %45 = arith.truncf %44 : vector<8x512xf32> to vector<8x512xbf16>
    %c0_33 = arith.constant 0 : index
    %c0_34 = arith.constant 0 : index
    %46 = vector.load %arg14[%c0_33, %c0_34] : memref<512x256xbf16, #tpu.memory_space<vmem>>, vector<512x256xbf16>
    %cst_35 = arith.constant dense<0.000000e+00> : vector<8x256xf32>
    %47 = tpu.matmul %45, %46, %cst_35 {dimension_numbers = #tpu.dot_dimension_numbers<[1], [0], [0], [1], [0, 0, 1, 1], [], []>} : vector<8x512xbf16>, vector<512x256xbf16>, vector<8x256xf32> -> vector<8x256xf32>
    %c0_36 = arith.constant 0 : index
    %c0_37 = arith.constant 0 : index
    %48 = vector.load %arg15[%c0_36, %c0_37] : memref<1x256xf32, #tpu.memory_space<vmem>>, vector<1x256xf32>
    %49 = vector.broadcast %48 : vector<1x256xf32> to vector<8x256xf32>
    %50 = arith.addf %47, %49 : vector<8x256xf32>
    %cst_38 = arith.constant 0.000000e+00 : f32
    %51 = vector.broadcast %cst_38 : f32 to vector<8x256xf32>
    %52 = arith.maximumf %50, %51 : vector<8x256xf32>
    %53 = arith.truncf %52 : vector<8x256xf32> to vector<8x256xbf16>
    %c0_39 = arith.constant 0 : index
    %c0_40 = arith.constant 0 : index
    %54 = vector.load %arg16[%c0_39, %c0_40] : memref<256x128xbf16, #tpu.memory_space<vmem>>, vector<256x128xbf16>
    %cst_41 = arith.constant dense<0.000000e+00> : vector<8x128xf32>
    %55 = tpu.matmul %53, %54, %cst_41 {dimension_numbers = #tpu.dot_dimension_numbers<[1], [0], [0], [1], [0, 0, 1, 1], [], []>} : vector<8x256xbf16>, vector<256x128xbf16>, vector<8x128xf32> -> vector<8x128xf32>
    %c0_42 = arith.constant 0 : index
    %c0_43 = arith.constant 0 : index
    %56 = vector.load %arg17[%c0_42, %c0_43] : memref<1x128xf32, #tpu.memory_space<vmem>>, vector<1x128xf32>
    %57 = vector.broadcast %56 : vector<1x128xf32> to vector<8x128xf32>
    %58 = arith.addf %55, %57 : vector<8x128xf32>
    %cst_44 = arith.constant 0.000000e+00 : f32
    %59 = vector.broadcast %cst_44 : f32 to vector<8x128xf32>
    %60 = arith.maximumf %58, %59 : vector<8x128xf32>
    %c0_45 = arith.constant 0 : index
    %c0_46 = arith.constant 0 : index
    %61 = vector.load %arg18[%c0_45, %c0_46] : memref<1x128xf32, #tpu.memory_space<vmem>>, vector<1x128xf32>
    %62 = vector.broadcast %61 : vector<1x128xf32> to vector<8x128xf32>
    %63 = arith.mulf %60, %62 : vector<8x128xf32>
    %cst_47 = arith.constant dense<0.000000e+00> : vector<8xf32>
    %64 = vector.multi_reduction <add>, %63, %cst_47 [1] : vector<8x128xf32> to vector<8xf32>
    %65 = vector.shape_cast %64 : vector<8xf32> to vector<8x1xf32>
    %c0_48 = arith.constant 0 : index
    %c0_49 = arith.constant 0 : index
    %66 = vector.load %arg19[%c0_48, %c0_49] : memref<1x1xf32, #tpu.memory_space<vmem>>, vector<1x1xf32>
    %67 = vector.broadcast %66 : vector<1x1xf32> to vector<8x1xf32>
    %68 = arith.addf %65, %67 : vector<8x1xf32>
    %c0_50 = arith.constant 0 : index
    %c0_51 = arith.constant 0 : index
    %69 = vector.load %arg20[%c0_50, %c0_51] : memref<8x128xf32, #tpu.memory_space<vmem>>, vector<8x64xf32>
    tpu.vector_store %arg20[%c0_50, %c0_51], %36 {strides = array<i32>} : memref<8x128xf32, #tpu.memory_space<vmem>>, vector<8x64xf32>,
    %70 = vector.shape_cast %68 : vector<8x1xf32> to vector<8x1xf32>
    %71 = vector.broadcast %70 : vector<8x1xf32> to vector<8x64xf32>
    %c0_52 = arith.constant 0 : index
    %c64 = arith.constant 64 : index
    %72 = vector.load %arg20[%c0_52, %c64] : memref<8x128xf32, #tpu.memory_space<vmem>>, vector<8x64xf32>
    tpu.vector_store %arg20[%c0_52, %c64], %71 {strides = array<i32>} : memref<8x128xf32, #tpu.memory_space<vmem>>, vector<8x64xf32>,
    return
  }
  func.func @transform_0(%arg0: i32) -> (i32, i32) {
    %c0_i32 = arith.constant 0 : i32
    %c0_i32_0 = arith.constant 0 : i32
    return %arg0, %c0_i32 : i32, i32
  }
  func.func @transform_1(%arg0: i32) -> (i32, i32) {
    %c0_i32 = arith.constant 0 : i32
    %c0_i32_0 = arith.constant 0 : i32
    %c0_i32_1 = arith.constant 0 : i32
    return %c0_i32, %c0_i32_0 : i32, i32
  }
  func.func @transform_2(%arg0: i32) -> (i32, i32) {
    %c0_i32 = arith.constant 0 : i32
    %c0_i32_0 = arith.constant 0 : i32
    %c0_i32_1 = arith.constant 0 : i32
    return %c0_i32, %c0_i32_0 : i32, i32
  }
  func.func @transform_3(%arg0: i32) -> (i32, i32) {
    %c0_i32 = arith.constant 0 : i32
    %c0_i32_0 = arith.constant 0 : i32
    %c0_i32_1 = arith.constant 0 : i32
    return %c0_i32, %c0_i32_0 : i32, i32
  }
  func.func @transform_4(%arg0: i32) -> (i32, i32) {
    %c0_i32 = arith.constant 0 : i32
    %c0_i32_0 = arith.constant 0 : i32
    %c0_i32_1 = arith.constant 0 : i32
    return %c0_i32, %c0_i32_0 : i32, i32
  }
  func.func @transform_5(%arg0: i32) -> (i32, i32) {
    %c0_i32 = arith.constant 0 : i32
    %c0_i32_0 = arith.constant 0 : i32
    %c0_i32_1 = arith.constant 0 : i32
    return %c0_i32, %c0_i32_0 : i32, i32
  }
  func.func @transform_6(%arg0: i32) -> (i32, i32) {
    %c0_i32 = arith.constant 0 : i32
    %c0_i32_0 = arith.constant 0 : i32
    %c0_i32_1 = arith.constant 0 : i32
    return %c0_i32, %c0_i32_0 : i32, i32
  }
  func.func @transform_7(%arg0: i32) -> (i32, i32) {
    %c0_i32 = arith.constant 0 : i32
    %c0_i32_0 = arith.constant 0 : i32
    %c0_i32_1 = arith.constant 0 : i32
    return %c0_i32, %c0_i32_0 : i32, i32
  }
  func.func @transform_8(%arg0: i32) -> (i32, i32) {
    %c0_i32 = arith.constant 0 : i32
    %c0_i32_0 = arith.constant 0 : i32
    %c0_i32_1 = arith.constant 0 : i32
    return %c0_i32, %c0_i32_0 : i32, i32
  }
  func.func @transform_9(%arg0: i32) -> (i32, i32) {
    %c0_i32 = arith.constant 0 : i32
    %c0_i32_0 = arith.constant 0 : i32
    %c0_i32_1 = arith.constant 0 : i32
    return %c0_i32, %c0_i32_0 : i32, i32
  }
  func.func @transform_10(%arg0: i32) -> (i32, i32) {
    %c0_i32 = arith.constant 0 : i32
    %c0_i32_0 = arith.constant 0 : i32
    %c0_i32_1 = arith.constant 0 : i32
    return %c0_i32, %c0_i32_0 : i32, i32
  }
  func.func @transform_11(%arg0: i32) -> (i32, i32) {
    %c0_i32 = arith.constant 0 : i32
    %c0_i32_0 = arith.constant 0 : i32
    %c0_i32_1 = arith.constant 0 : i32
    return %c0_i32, %c0_i32_0 : i32, i32
  }
  func.func @transform_12(%arg0: i32) -> (i32, i32) {
    %c0_i32 = arith.constant 0 : i32
    %c0_i32_0 = arith.constant 0 : i32
    %c0_i32_1 = arith.constant 0 : i32
    return %c0_i32, %c0_i32_0 : i32, i32
  }
  func.func @transform_13(%arg0: i32) -> (i32, i32) {
    %c0_i32 = arith.constant 0 : i32
    %c0_i32_0 = arith.constant 0 : i32
    %c0_i32_1 = arith.constant 0 : i32
    return %c0_i32, %c0_i32_0 : i32, i32
  }
  func.func @transform_14(%arg0: i32) -> (i32, i32) {
    %c0_i32 = arith.constant 0 : i32
    %c0_i32_0 = arith.constant 0 : i32
    %c0_i32_1 = arith.constant 0 : i32
    return %c0_i32, %c0_i32_0 : i32, i32
  }
  func.func @transform_15(%arg0: i32) -> (i32, i32) {
    %c0_i32 = arith.constant 0 : i32
    %c0_i32_0 = arith.constant 0 : i32
    %c0_i32_1 = arith.constant 0 : i32
    return %c0_i32, %c0_i32_0 : i32, i32
  }
  func.func @transform_16(%arg0: i32) -> (i32, i32) {
    %c0_i32 = arith.constant 0 : i32
    %c0_i32_0 = arith.constant 0 : i32
    %c0_i32_1 = arith.constant 0 : i32
    return %c0_i32, %c0_i32_0 : i32, i32
  }
  func.func @transform_17(%arg0: i32) -> (i32, i32) {
    %c0_i32 = arith.constant 0 : i32
    %c0_i32_0 = arith.constant 0 : i32
    %c0_i32_1 = arith.constant 0 : i32
    return %c0_i32, %c0_i32_0 : i32, i32
  }
  func.func @transform_18(%arg0: i32) -> (i32, i32) {
    %c0_i32 = arith.constant 0 : i32
    %c0_i32_0 = arith.constant 0 : i32
    %c0_i32_1 = arith.constant 0 : i32
    return %c0_i32, %c0_i32_0 : i32, i32
  }
  func.func @transform_19(%arg0: i32) -> (i32, i32) {
    %c0_i32 = arith.constant 0 : i32
    %c0_i32_0 = arith.constant 0 : i32
    return %arg0, %c0_i32 : i32, i32
  }
}

</mosaic_0001>

<bundles_post_ra>
// kernel: genenet_forward.1
= control target key start
LH: loop header
LB: loop body
LE: loop exit
PB: predicated region body
PF: predicated region fallthrough
CT: control target
= control target key end

     0   :  { %s3356_s0 = inlined_call_operand.vmem [shape: f32[8,16], index: 0, kind: input, shape index: {}]   ;;  %s3357_s1 = inlined_call_operand.hbm [shape: bf16[16,64], index: 1, kind: input, shape index: {}]   ;;  %s3358_s2 = inlined_call_operand.vmem [shape: f32[1,64], index: 2, kind: input, shape index: {}]   ;;  %s3359_s3 = inlined_call_operand.vmem [shape: bf16[64,512], index: 3, kind: input, shape index: {}]   ;;  %s3360_s4 = inlined_call_operand.hbm [shape: f32[1,512], index: 4, kind: input, shape index: {}]   ;;  %s3361_s5 = inlined_call_operand.hbm [shape: bf16[512,256], index: 5, kind: input, shape index: {}]   ;;  %s3362_s6 = inlined_call_operand.hbm [shape: f32[1,256], index: 6, kind: input, shape index: {}]   ;;  %s3363_s7 = inlined_call_operand.vmem [shape: bf16[256,64], index: 7, kind: input, shape index: {}]   ;;  %s3364_s8 = inlined_call_operand.hbm [shape: f32[1,64], index: 8, kind: input, shape index: {}]   ;;  %s3365_s9 = inlined_call_operand.hbm [shape: f32[1,64], index: 9, kind: input, shape index: {}]   ;;  %s3366_s10 = inlined_call_operand.hbm [shape: f32[1,64], index: 10, kind: input, shape index: {}]   ;;  %s3367_s11 = inlined_call_operand.hbm [shape: bf16[64,512], index: 11, kind: input, shape index: {}]   ;;  %s3368_s12 = inlined_call_operand.hbm [shape: f32[1,512], index: 12, kind: input, shape index: {}]   ;;  %s3369_s13 = inlined_call_operand.hbm [shape: bf16[512,256], index: 13, kind: input, shape index: {}]   ;;  %s3370_s14 = inlined_call_operand.hbm [shape: f32[1,256], index: 14, kind: input, shape index: {}]   ;;  %s3371_s15 = inlined_call_operand.vmem [shape: bf16[256,128], index: 15, kind: input, shape index: {}]   ;;  %s3372_s16 = inlined_call_operand.vmem [shape: f32[1,128], index: 16, kind: input, shape index: {}]   ;;  %s3373_s17 = inlined_call_operand.vmem [shape: f32[1,128], index: 17, kind: input, shape index: {}]   ;;  %s3374_s18 = inlined_call_operand.<no memory space> [shape: f32[1,1], index: 18, kind: input, shape index: {}]   ;;  %s3375_s19 = inlined_call_operand.vmem [shape: f32[8,128], index: 19, kind: output, shape index: {}]  }
   0x1   :  { %3378 = sst [smem:[#allocation26_spill]] %s3356_s0  ;;  %v24_v0 = vstv %s3374_s18 }
   0x2   :  { %3379 = sst [smem:[#allocation27_spill]] %s3357_s1  ;;  %25 = vst [vmem:[#allocation2] sm:$0x1] %v24_v0 }
   0x3   :  { %3380 = sst [smem:[#allocation28_spill]] %s3358_s2 }
   0x4   :  { %3381 = sst [smem:[#allocation29_spill]] %s3359_s3 }
   0x5   :  { %26 = vsyncpa [#allocation4], 0 }
   0x6   :  { %27 = vsyncpa [#allocation6], 0 }
   0x7   :  { %28 = vsyncpa [#allocation9], 0 }
   0x8   :  { %29 = vsyncpa [#allocation12], 0 }
   0x9   :  { %30 = vsyncpa [#allocation15], 0 }
   0xa   :  { %31 = vsyncpa [#allocation18], 0  ;;  %s2871_s20 = smov [#allocation5]   ;;  %s2872_s1 = smov [#allocation8]  }
   0xb   :  { %s56_s21 = sshll.u32 %s2871_s20, 4  ;;  %s78_s22 = sshll.u32 %s2872_s1, 4  ;;  %s57_s21 = int_to_ptr.vmem [resolvable:$true] %s56_s21  ;;  %s79_s22 = int_to_ptr.vmem [resolvable:$true] %s78_s22 }
   0xc   :  { %s2617_s24 = scalar_lea.hbm %s3360_s4, 64 }
   0xd   :  { %p2618_p0 = scmp.ne.s32.totalorder %s3360_s4, %s2617_s24  ;;  %p2621_p1 = scmp.lt.u32.totalorder %s2617_s24, %s3360_s4 }
   0xf   :  { %p2623_p2 = pnand %p2621_p1, %p2618_p0 }
  0x11   :  { %2626 = shalt.err (!%p2623_p2)
}
  0x12   :  { %s2627_s27 = scalar_lea.vmem %s57_s21, 64  ;;  %p2632_p4 = scmp.lt.s32.totalorder %s57_s21, %s57_s21 }
  0x13   :  { %p2628_p3 = scmp.ne.s32.totalorder %s57_s21, %s2627_s27  ;;  %p2633_p5 = scmp.lt.s32.totalorder %s2627_s27, %s2627_s27 }
  0x15   :  { %p2634_p6 = por %p2633_p5, %p2632_p4 }
  0x17   :  { %p2635_p7 = pnand %p2634_p6, %p2628_p3 }
  0x19   :  { %2638 = shalt.err (!%p2635_p7)
}
  0x1a   :  { %59 = dma.hbm_to_vmem [thread:$0]  %s3360_s4, 64, %s57_s21, [#allocation6]  }
  0x1b   :  { %s2639_s20 = scalar_lea.hbm %s3362_s6, 32 }
  0x1c   :  { %p2640_p8 = scmp.ne.s32.totalorder %s3362_s6, %s2639_s20  ;;  %p2643_p9 = scmp.lt.u32.totalorder %s2639_s20, %s3362_s6 }
  0x1e   :  { %p2645_p10 = pnand %p2643_p9, %p2640_p8 }
  0x20   :  { %2648 = shalt.err (!%p2645_p10)
}
  0x21   :  { %s2649_s25 = scalar_lea.vmem %s79_s22, 32  ;;  %p2654_p12 = scmp.lt.s32.totalorder %s79_s22, %s79_s22 }
  0x22   :  { %p2650_p11 = scmp.ne.s32.totalorder %s79_s22, %s2649_s25  ;;  %p2655_p13 = scmp.lt.s32.totalorder %s2649_s25, %s2649_s25 }
  0x24   :  { %p2656_p0 = por %p2655_p13, %p2654_p12 }
  0x26   :  { %p2657_p1 = pnand %p2656_p0, %p2650_p11 }
  0x28   :  { %2660 = shalt.err (!%p2657_p1)
}
  0x29   :  { %81 = dma.hbm_to_vmem [thread:$0]  %s3362_s6, 32, %s79_s22, [#allocation9]  }
  0x2a   :  { %s2873_s3 = smov [#allocation11]   ;;  %s2874_s26 = smov [#allocation14]  }
  0x2b   :  { %s100_s18 = sshll.u32 %s2873_s3, 4  ;;  %s119_s27 = sshll.u32 %s2874_s26, 4  ;;  %s101_s18 = int_to_ptr.vmem [resolvable:$true] %s100_s18  ;;  %s3018_s27 = int_to_ptr.vmem [resolvable:$true] %s119_s27 }
  0x2c   :  { %s2661_s0 = scalar_lea.hbm %s3365_s9, 16 }
  0x2d   :  { %p2662_p2 = scmp.ne.s32.totalorder %s3365_s9, %s2661_s0  ;;  %p2665_p3 = scmp.lt.u32.totalorder %s2661_s0, %s3365_s9 }
  0x2f   :  { %p2667_p4 = pnand %p2665_p3, %p2662_p2 }
  0x31   :  { %2670 = shalt.err (!%p2667_p4)
}
  0x32   :  { %s2671_s6 = scalar_lea.vmem %s101_s18, 16  ;;  %s2675_s22 = scalar_lea.vmem %s101_s18, 32 }
  0x33   :  { %p2672_p5 = scmp.ne.s32.totalorder %s101_s18, %s2671_s6  ;;  %p2676_p6 = scmp.lt.s32.totalorder %s101_s18, %s101_s18 }
  0x34   :  { %p2677_p7 = scmp.lt.s32.totalorder %s2675_s22, %s2671_s6 }
  0x36   :  { %p2678_p8 = por %p2677_p7, %p2676_p6 }
  0x38   :  { %p2679_p9 = pnand %p2678_p8, %p2672_p5 }
  0x3a   :  { %2682 = shalt.err (!%p2679_p9)
}
  0x3b   :  { %103 = dma.hbm_to_vmem [thread:$0]  %s3365_s9, 16, %s101_s18, [#allocation12]  }
  0x3c   :  { %s2683_s21 = scalar_lea.hbm %s3367_s11, 2048 }
  0x3d   :  { %p2684_p10 = scmp.ne.s32.totalorder %s3367_s11, %s2683_s21  ;;  %p2687_p11 = scmp.lt.u32.totalorder %s2683_s21, %s3367_s11 }
  0x3f   :  { %p2689_p12 = pnand %p2687_p11, %p2684_p10 }
  0x41   :  { %2692 = shalt.err (!%p2689_p12)
}
  0x42   :  { %s2693_s0 = scalar_lea.vmem %s3018_s27, 2048  ;;  %p2698_p0 = scmp.lt.s32.totalorder %s3018_s27, %s3018_s27 }
  0x43   :  { %p2694_p13 = scmp.ne.s32.totalorder %s3018_s27, %s2693_s0  ;;  %p2699_p1 = scmp.lt.s32.totalorder %s2693_s0, %s2693_s0 }
  0x45   :  { %p2700_p2 = por %p2699_p1, %p2698_p0 }
  0x47   :  { %p2701_p3 = pnand %p2700_p2, %p2694_p13 }
  0x49   :  { %2704 = shalt.err (!%p2701_p3)
}
  0x4a   :  { %s2875_s9 = smov 256   ;;  %s2876_s18 = smov 16  }
  0x4b   :  { %125 = dma.hbm_to_vmem [thread:$0]  %s3367_s11, 2048, %s3018_s27, [#allocation15], %s2875_s9, %s2875_s9, %s2876_s18  }
  0x4c   :  { %s2877_s1 = smov [#allocation17]   ;;  %s2878_s6 = smov [#allocation3]  }
  0x4d   :  { %s141_s2 = sshll.u32 %s2877_s1, 4  ;;  %s39_s22 = sshll.u32 %s2878_s6, 4  ;;  %s142_s2 = int_to_ptr.vmem [resolvable:$true] %s141_s2  ;;  %s3049_s22 = int_to_ptr.vmem [resolvable:$true] %s39_s22 }
  0x4e   :  { %s2705_s25 = scalar_lea.hbm %s3369_s13, 8192 }
  0x4f   :  { %p2706_p4 = scmp.ne.s32.totalorder %s3369_s13, %s2705_s25  ;;  %p2709_p5 = scmp.lt.u32.totalorder %s2705_s25, %s3369_s13 }
  0x51   :  { %p2711_p6 = pnand %p2709_p5, %p2706_p4 }
  0x53   :  { %2714 = shalt.err (!%p2711_p6)
}
  0x54   :  { %s2715_s11 = scalar_lea.vmem %s142_s2, 8192  ;;  %p2720_p8 = scmp.lt.s32.totalorder %s142_s2, %s142_s2 }
  0x55   :  { %p2716_p7 = scmp.ne.s32.totalorder %s142_s2, %s2715_s11  ;;  %p2721_p9 = scmp.lt.s32.totalorder %s2715_s11, %s2715_s11 }
  0x57   :  { %p2722_p10 = por %p2721_p9, %p2720_p8 }
  0x59   :  { %p2723_p11 = pnand %p2722_p10, %p2716_p7 }
  0x5b   :  { %2726 = shalt.err (!%p2723_p11)
}
  0x5c   :  { %s2879_s27 = smov 128   ;;  %s2880_s28 = smov 8  }
  0x5d   :  { %147 = dma.hbm_to_vmem [thread:$0]  %s3369_s13, 8192, %s142_s2, [#allocation18], %s2879_s27, %s2879_s27, %s2880_s28  }
  0x5e   :  { %s3382_s30 = sld [smem:[#allocation27_spill]] }
  0x64   :  { %s2727_s20 = scalar_lea.hbm %s3382_s30, 128 }
  0x65   :  { %p2728_p12 = scmp.ne.s32.totalorder %s3382_s30, %s2727_s20  ;;  %p2731_p13 = scmp.lt.u32.totalorder %s2727_s20, %s3382_s30 }
  0x67   :  { %p2733_p0 = pnand %p2731_p13, %p2728_p12 }
  0x69   :  { %2736 = shalt.err (!%p2733_p0)
}
  0x6a   :  { %s2737_s25 = scalar_lea.vmem %s3049_s22, 128  ;;  %p2742_p2 = scmp.lt.s32.totalorder %s3049_s22, %s3049_s22 }
  0x6b   :  { %p2738_p1 = scmp.ne.s32.totalorder %s3049_s22, %s2737_s25  ;;  %p2743_p3 = scmp.lt.s32.totalorder %s2737_s25, %s2737_s25 }
  0x6d   :  { %p2744_p4 = por %p2743_p3, %p2742_p2 }
  0x6f   :  { %p2745_p5 = pnand %p2744_p4, %p2738_p1 }
  0x71   :  { %2748 = shalt.err (!%p2745_p5)
}
  0x72   :  { %s2881_s13 = smov 64   ;;  %s2882_s2 = smov 4  }
  0x73   :  { %45 = dma.hbm_to_vmem [thread:$0]  %s3382_s30, 128, %s3049_s22, [#allocation4], %s2881_s13, %s2881_s13, %s2882_s2  }
  0x74   :  { %s2883_s3 = smov [#allocation7]   ;;  %s2884_s11 = smov [#allocation10]  }
  0x75   :  { %s65_s26 = sshll.u32 %s2883_s3, 4  ;;  %s90_s29 = sshll.u32 %s2884_s11, 4  ;;  %s66_s26 = int_to_ptr.vmem [resolvable:$true] %s65_s26  ;;  %s91_s29 = int_to_ptr.vmem [resolvable:$true] %s90_s29 }
  0x76   :  { %s2749_s18 = scalar_lea.hbm %s3361_s5, 8192 }
  0x77   :  { %p2750_p6 = scmp.ne.s32.totalorder %s3361_s5, %s2749_s18  ;;  %p2753_p7 = scmp.lt.u32.totalorder %s2749_s18, %s3361_s5 }
  0x79   :  { %p2755_p8 = pnand %p2753_p7, %p2750_p6 }
  0x7b   :  { %2758 = shalt.err (!%p2755_p8)
}
  0x7c   :  { %s2759_s22 = scalar_lea.vmem %s66_s26, 8192  ;;  %p2764_p10 = scmp.lt.s32.totalorder %s66_s26, %s66_s26 }
  0x7d   :  { %p2760_p9 = scmp.ne.s32.totalorder %s66_s26, %s2759_s22  ;;  %p2765_p11 = scmp.lt.s32.totalorder %s2759_s22, %s2759_s22 }
  0x7f   :  { %p2766_p12 = por %p2765_p11, %p2764_p10 }
  0x81   :  { %p2767_p13 = pnand %p2766_p12, %p2760_p9 }
  0x83   :  { %2770 = shalt.err (!%p2767_p13)
}
  0x84   :  { %71 = dma.hbm_to_vmem [thread:$0]  %s3361_s5, 8192, %s66_s26, [#allocation6], %s2879_s27, %s2879_s27, %s2880_s28  }
  0x85   :  { %s2771_s2 = scalar_lea.hbm %s3364_s8, 16 }
  0x86   :  { %p2772_p0 = scmp.ne.s32.totalorder %s3364_s8, %s2771_s2  ;;  %p2775_p1 = scmp.lt.u32.totalorder %s2771_s2, %s3364_s8 }
  0x88   :  { %p2777_p2 = pnand %p2775_p1, %p2772_p0 }
  0x8a   :  { %2780 = shalt.err (!%p2777_p2)
}
  0x8b   :  { %s2781_s0 = scalar_lea.vmem %s91_s29, 16  ;;  %s2785_s9 = scalar_lea.vmem %s91_s29, 32 }
  0x8c   :  { %p2782_p3 = scmp.ne.s32.totalorder %s91_s29, %s2781_s0  ;;  %p2786_p4 = scmp.lt.s32.totalorder %s91_s29, %s91_s29 }
  0x8d   :  { %p2787_p5 = scmp.lt.s32.totalorder %s2785_s9, %s2781_s0 }
  0x8f   :  { %p2788_p6 = por %p2787_p5, %p2786_p4 }
  0x91   :  { %p2789_p7 = pnand %p2788_p6, %p2782_p3 }
  0x93   :  { %2792 = shalt.err (!%p2789_p7)
}
  0x94   :  { %93 = dma.hbm_to_vmem [thread:$0]  %s3364_s8, 16, %s91_s29, [#allocation9]  }
  0x95   :  { %s2885_s28 = smov [#allocation13]   ;;  %s2886_s18 = smov [#allocation16]  }
  0x96   :  { %s110_s26 = sshll.u32 %s2885_s28, 4  ;;  %s132_s20 = sshll.u32 %s2886_s18, 4  ;;  %s111_s26 = int_to_ptr.vmem [resolvable:$true] %s110_s26  ;;  %s133_s20 = int_to_ptr.vmem [resolvable:$true] %s132_s20 }
  0x97   :  { %s2793_s23 = scalar_lea.hbm %s3366_s10, 16 }
  0x98   :  { %p2794_p8 = scmp.ne.s32.totalorder %s3366_s10, %s2793_s23  ;;  %p2797_p9 = scmp.lt.u32.totalorder %s2793_s23, %s3366_s10 }
  0x9a   :  { %p2799_p10 = pnand %p2797_p9, %p2794_p8 }
  0x9c   :  { %2802 = shalt.err (!%p2799_p10)
}
  0x9d   :  { %s2803_s8 = scalar_lea.vmem %s111_s26, 16  ;;  %s2807_s29 = scalar_lea.vmem %s111_s26, 32 }
  0x9e   :  { %p2804_p11 = scmp.ne.s32.totalorder %s111_s26, %s2803_s8  ;;  %p2808_p12 = scmp.lt.s32.totalorder %s111_s26, %s111_s26 }
  0x9f   :  { %p2809_p13 = scmp.lt.s32.totalorder %s2807_s29, %s2803_s8 }
  0xa1   :  { %p2810_p0 = por %p2809_p13, %p2808_p12 }
  0xa3   :  { %p2811_p1 = pnand %p2810_p0, %p2804_p11 }
  0xa5   :  { %2814 = shalt.err (!%p2811_p1)
}
  0xa6   :  { %113 = dma.hbm_to_vmem [thread:$0]  %s3366_s10, 16, %s111_s26, [#allocation12]  }
  0xa7   :  { %s2815_s3 = scalar_lea.hbm %s3368_s12, 64 }
  0xa8   :  { %p2816_p2 = scmp.ne.s32.totalorder %s3368_s12, %s2815_s3  ;;  %p2819_p3 = scmp.lt.u32.totalorder %s2815_s3, %s3368_s12 }
  0xaa   :  { %p2821_p4 = pnand %p2819_p3, %p2816_p2 }
  0xac   :  { %2824 = shalt.err (!%p2821_p4)
}
  0xad   :  { %s2825_s27 = scalar_lea.vmem %s133_s20, 64  ;;  %p2830_p6 = scmp.lt.s32.totalorder %s133_s20, %s133_s20 }
  0xae   :  { %p2826_p5 = scmp.ne.s32.totalorder %s133_s20, %s2825_s27  ;;  %p2831_p7 = scmp.lt.s32.totalorder %s2825_s27, %s2825_s27 }
  0xb0   :  { %p2832_p8 = por %p2831_p7, %p2830_p6 }
  0xb2   :  { %p2833_p9 = pnand %p2832_p8, %p2826_p5 }
  0xb4   :  { %2836 = shalt.err (!%p2833_p9)
}
  0xb5   :  { %135 = dma.hbm_to_vmem [thread:$0]  %s3368_s12, 64, %s133_s20, [#allocation15]  }
  0xb6   :  { %s2887_s26 = smov [#allocation19]   ;;  %s2837_s23 = scalar_lea.hbm %s3370_s14, 32 }
  0xb7   :  { %s154_s18 = sshll.u32 %s2887_s26, 4  ;;  %p2838_p10 = scmp.ne.s32.totalorder %s3370_s14, %s2837_s23  ;;  %s155_s18 = int_to_ptr.vmem [resolvable:$true] %s154_s18 }
  0xb8   :  { %p2841_p11 = scmp.lt.u32.totalorder %s2837_s23, %s3370_s14 }
  0xba   :  { %p2843_p12 = pnand %p2841_p11, %p2838_p10 }
  0xbc   :  { %2846 = shalt.err (!%p2843_p12)
}
  0xbd   :  { %s2847_s8 = scalar_lea.vmem %s155_s18, 32  ;;  %p2852_p0 = scmp.lt.s32.totalorder %s155_s18, %s155_s18 }
  0xbe   :  { %p2848_p13 = scmp.ne.s32.totalorder %s155_s18, %s2847_s8  ;;  %p2853_p1 = scmp.lt.s32.totalorder %s2847_s8, %s2847_s8 }
  0xc0   :  { %p2854_p2 = por %p2853_p1, %p2852_p0 }
  0xc2   :  { %p2855_p3 = pnand %p2854_p2, %p2848_p13 }
  0xc4   :  { %2858 = shalt.err (!%p2855_p3)
}
  0xc5   :  { %157 = dma.hbm_to_vmem [thread:$0]  %s3370_s14, 32, %s155_s18, [#allocation18]  }
  0xc6   :  { %2859 = dma.done.wait [#allocation4], 128  }
  0xc7   :  { %2860 = vsyncadd [#allocation4], 4294967168 }
  0xc8   :  { %2861 = dma.done.wait [#allocation6], 8256  }
  0xc9   :  { %2862 = vsyncadd [#allocation6], 4294959040 }
  0xca   :  { %2863 = dma.done.wait [#allocation9], 48  }
  0xcb   :  { %2864 = vsyncadd [#allocation9], 4294967248 }
  0xcc   :  { %2865 = dma.done.wait [#allocation12], 32  }
  0xcd   :  { %2866 = vsyncadd [#allocation12], 4294967264 }
  0xce   :  { %2867 = dma.done.wait [#allocation15], 2112  }
  0xcf   :  { %2868 = vsyncadd [#allocation15], 4294965184 }
  0xd0   :  { %2869 = dma.done.wait [#allocation18], 8224  }
  0xd1   :  { %2870 = vsyncadd [#allocation18], 4294959072  ;;  %v2888_v1 = vmov 0.0   ;;  %vm2889_vm0 = vmmov 0   ;;  %v2344_v2 = vld [vmem:[#allocation3] sm:$0xff]   ;;  %s3383_s14 = sld [smem:[#allocation26_spill]] }
  0xd2   :  { %2305 = vmatprep.subr.bf16.mxu0 %v2888_v1  ;;  %2307 = vmatprep.mubr.msk.bf16.mxu0 %vm2889_vm0, %v2888_v1  ;;  %vm217_vm1 = vcmask 130048   ;;  %s3384_s21 = sld [smem:[#allocation29_spill]]  ;;  %v2890_v14 = vmov 0   ;;  %s3385_s12 = sld [smem:[#allocation28_spill]]  ;;  %vm380_vm2 = vcmask 523264   ;;  %v2465_v62 = vld [vmem:[%s3363_s7 + $0x40] sm:$0xff]  }
  0xd3   :  { %2306 = vmatpush3.bf16.msra.mxu0 %v2344_v2  ;;  %416 = vmatprep.mubr.bf16.mxu1 %v2890_v14  ;;  %v2371_v29 = vld [vmem:[#allocation7 + $0x4] ss:$8 sps:$4 sm:$0xff]   ;;  %v2369_v30 = vld [vmem:[#allocation7] ss:$8 sps:$4 sm:$0xff]   ;;  %v2374_v31 = vld [vmem:[#allocation7 + $0x14] ss:$8 sps:$4 sm:$0xff]  }
  0xd4   :  { %2343 = vset.pattern.permute.xlu0 %v2890_v14  ;;  %v2372_v32 = vld [vmem:[#allocation7 + $0x10] ss:$8 sps:$4 sm:$0xff]   ;;  %v2377_v33 = vld [vmem:[#allocation7 + $0x24] ss:$8 sps:$4 sm:$0xff]   ;;  %v2375_v34 = vld [vmem:[#allocation7 + $0x20] ss:$8 sps:$4 sm:$0xff]   ;;  %2261 = vmatprep.subr.bf16.mxu0 %v2465_v62 }
  0xd5   :  { %v2380_v35 = vld [vmem:[#allocation7 + $0x34] ss:$8 sps:$4 sm:$0xff]   ;;  %v2378_v36 = vld [vmem:[#allocation7 + $0x30] ss:$8 sps:$4 sm:$0xff]   ;;  %v2383_v37 = vld [vmem:[#allocation7 + $0x44] ss:$8 sps:$4 sm:$0xff]  }
  0xd6   :  { %v2381_v38 = vld [vmem:[#allocation7 + $0x40] ss:$8 sps:$4 sm:$0xff]   ;;  %v2386_v39 = vld [vmem:[#allocation7 + $0x54] ss:$8 sps:$4 sm:$0xff]   ;;  %v2384_v40 = vld [vmem:[#allocation7 + $0x50] ss:$8 sps:$4 sm:$0xff]  }
  0xd7   :  { %v200_v3 = vld [vmem:[%s3383_s14] sm:$0xff]  ;;  %v2389_v41 = vld [vmem:[#allocation7 + $0x64] ss:$8 sps:$4 sm:$0xff]   ;;  %v2387_v42 = vld [vmem:[#allocation7 + $0x60] ss:$8 sps:$4 sm:$0xff]   ;;  %vm2042_vm3 = vcmask 1048064  }
  0xd8   :  { %v201_v4 = vpack.c.bf16 %v200_v3, %v200_v3  ;;  %v2345_v5 = vld [vmem:[%s3384_s21 + $0x4] ss:$16 sps:$4 sm:$0xff]   ;;  %v2347_v6 = vld [vmem:[%s3384_s21] ss:$16 sps:$4 sm:$0xff]   ;;  %v2359_v13 = vld [vmem:[%s3384_s21 + $0xc] ss:$16 sps:$4 sm:$0xff]  }
  0xd9   :  { %v2348_v7 = vld [vmem:[%s3384_s21 + $0x24] ss:$16 sps:$4 sm:$0xff]   ;;  %384 = vmatprep.subr.bf16.mxu1 %v2345_v5  ;;  %v2350_v8 = vld [vmem:[%s3384_s21 + $0x20] ss:$16 sps:$4 sm:$0xff]   ;;  %v2357_v20 = vld [vmem:[%s3384_s21 + $0x8] ss:$16 sps:$4 sm:$0xff]  }
  0xda   :  { %2308 = vmatmul.mubr.msk.bf16.vlgmr.msra.gmra.mrb[0].mxu0 %vm217_vm1, %v201_v4  ;;  %385 = vmatpush1.bf16.msra.mxu1 %v2347_v6  ;;  %v2351_v9 = vld [vmem:[%s3384_s21 + $0x44] ss:$16 sps:$4 sm:$0xff]   ;;  %v2353_v10 = vld [vmem:[%s3384_s21 + $0x40] ss:$16 sps:$4 sm:$0xff]   ;;  %v2362_v23 = vld [vmem:[%s3384_s21 + $0x2c] ss:$16 sps:$4 sm:$0xff]  }
  0xdb   :  { %386 = vmatprep.subr.bf16.mxu1 %v2348_v7  ;;  %v2354_v11 = vld [vmem:[%s3384_s21 + $0x64] ss:$16 sps:$4 sm:$0xff]   ;;  %v2356_v12 = vld [vmem:[%s3384_s21 + $0x60] ss:$16 sps:$4 sm:$0xff]   ;;  %v2360_v24 = vld [vmem:[%s3384_s21 + $0x28] ss:$16 sps:$4 sm:$0xff]  }
  0xdc   :  { %v2054_v15 = vld [vmem:[%s3385_s12] ss:$0 sm:$0xff]  ;;  %v2365_v25 = vld [vmem:[%s3384_s21 + $0x4c] ss:$16 sps:$4 sm:$0xff]   ;;  %v2363_v26 = vld [vmem:[%s3384_s21 + $0x48] ss:$16 sps:$4 sm:$0xff]  }
  0xdd   :  { %v2368_v27 = vld [vmem:[%s3384_s21 + $0x6c] ss:$16 sps:$4 sm:$0xff]   ;;  %v2366_v28 = vld [vmem:[%s3384_s21 + $0x68] ss:$16 sps:$4 sm:$0xff]   ;;  %v2466_v63 = vld [vmem:[%s3363_s7] sm:$0xff]  }
  0xde   :  { %387 = vmatpush1.bf16.msra.mxu1 %v2350_v8  ;;  %v2392_v43 = vld [vmem:[#allocation7 + $0x74] ss:$8 sps:$4 sm:$0xff]   ;;  %v2390_v44 = vld [vmem:[#allocation7 + $0x70] ss:$8 sps:$4 sm:$0xff]   ;;  %v2395_v45 = vld [vmem:[#allocation7 + $0x84] ss:$8 sps:$4 sm:$0xff]   ;;  %2262 = vmatpush3.bf16.msra.mxu0 %v2466_v63 }
  0xdf   :  { %388 = vmatprep.subr.bf16.mxu1 %v2351_v9  ;;  %v2393_v46 = vld [vmem:[#allocation7 + $0x80] ss:$8 sps:$4 sm:$0xff]   ;;  %v2398_v47 = vld [vmem:[#allocation7 + $0x94] ss:$8 sps:$4 sm:$0xff]   ;;  %v2396_v48 = vld [vmem:[#allocation7 + $0x90] ss:$8 sps:$4 sm:$0xff]  }
  0xe0   :  { %v2401_v49 = vld [vmem:[#allocation7 + $0xa4] ss:$8 sps:$4 sm:$0xff]   ;;  %v2399_v50 = vld [vmem:[#allocation7 + $0xa0] ss:$8 sps:$4 sm:$0xff]   ;;  %v2404_v51 = vld [vmem:[#allocation7 + $0xb4] ss:$8 sps:$4 sm:$0xff]  }
  0xe1   :  { %v2402_v52 = vld [vmem:[#allocation7 + $0xb0] ss:$8 sps:$4 sm:$0xff]   ;;  %v2407_v53 = vld [vmem:[#allocation7 + $0xc4] ss:$8 sps:$4 sm:$0xff]   ;;  %v2405_v54 = vld [vmem:[#allocation7 + $0xc0] ss:$8 sps:$4 sm:$0xff]  }
  0xe2   :  { %389 = vmatpush1.bf16.msra.mxu1 %v2353_v10  ;;  %v2410_v55 = vld [vmem:[#allocation7 + $0xd4] ss:$8 sps:$4 sm:$0xff]   ;;  %v2408_v56 = vld [vmem:[#allocation7 + $0xd0] ss:$8 sps:$4 sm:$0xff]   ;;  %v2413_v57 = vld [vmem:[#allocation7 + $0xe4] ss:$8 sps:$4 sm:$0xff]   ;;  %v280_v10 = vlaneseq }
  0xe3   :  { %390 = vmatprep.subr.bf16.mxu1 %v2354_v11  ;;  %v2411_v58 = vld [vmem:[#allocation7 + $0xe0] ss:$8 sps:$4 sm:$0xff]   ;;  %v2416_v59 = vld [vmem:[#allocation7 + $0xf4] ss:$8 sps:$4 sm:$0xff]   ;;  %v2414_v60 = vld [vmem:[#allocation7 + $0xf0] ss:$8 sps:$4 sm:$0xff]  }
  0xe4   :  { %v2419_v61 = vld [vmem:[#allocation7 + $0x104] ss:$8 sps:$4 sm:$0xff]   ;;  %v2467_v0 = vld [vmem:[%s3363_s7 + $0x48] sm:$0xff]   ;;  %v2473_v6 = vld [vmem:[%s3363_s7 + $0x60] sm:$0xff]   ;;  %v3241_v11 = vshrl.u32 %v280_v10, 7 }
  0xe5   :  { %v2468_v1 = vld [vmem:[%s3363_s7 + $0x8] sm:$0xff]   ;;  %2263 = vmatprep.subr.bf16.mxu0 %v2467_v0  ;;  %v2469_v2 = vld [vmem:[%s3363_s7 + $0x50] sm:$0xff]   ;;  %v2471_v4 = vld [vmem:[%s3363_s7 + $0x58] sm:$0xff]  }
  0xe6   :  { %391 = vmatpush1.bf16.msra.mxu1 %v2356_v12  ;;  %2264 = vmatpush3.bf16.msra.mxu0 %v2468_v1  ;;  %v2470_v3 = vld [vmem:[%s3363_s7 + $0x10] sm:$0xff]   ;;  %v2472_v5 = vld [vmem:[%s3363_s7 + $0x18] sm:$0xff]   ;;  %v2474_v7 = vld [vmem:[%s3363_s7 + $0x20] sm:$0xff]   ;;  %v3244_v12 = vsub.s32 0, %v3241_v11  ;;  %v290_v62 = vsub.s32 2, %v3241_v11 }
  0xe7   :  { %425 = vmatprep.subr.bf16.mxu1 %v2359_v13  ;;  %2265 = vmatprep.subr.bf16.mxu0 %v2469_v2  ;;  %v2475_v8 = vld [vmem:[%s3363_s7 + $0x68] sm:$0xff]   ;;  %v2461_v2 = vld [vmem:[#allocation7 + $0x1e4] ss:$8 sps:$4 sm:$0xff]  }
  0xe8   :  { %v2476_v9 = vld [vmem:[%s3363_s7 + $0x28] sm:$0xff]   ;;  %v2478_v10 = vld [vmem:[%s3363_s7 + $0x30] sm:$0xff]  }
  0xe9   :  { %v3246_v13 = vld [vmem:[#allocation5] sm:$0xf]  ;;  %v2456_v0 = vld [vmem:[#allocation7 + $0x1d0] ss:$8 sps:$4 sm:$0xff]  }
  0xea   :  { %2266 = vmatpush3.bf16.msra.mxu0 %v2470_v3  ;;  %v2458_v63 = vld [vmem:[#allocation7 + $0x1d4] ss:$8 sps:$4 sm:$0xff]   ;;  %v291_v1 = vrot.slane %v3246_v13, %v290_v62  ;;  %v2459_v3 = vld [vmem:[#allocation7 + $0x1e0] ss:$8 sps:$4 sm:$0xff]  }
  0xeb   :  { %2267 = vmatprep.subr.bf16.mxu0 %v2471_v4 }
  0xee   :  { %2268 = vmatpush3.bf16.msra.mxu0 %v2472_v5  ;;  %v2464_v5 = vld [vmem:[#allocation7 + $0x1f4] ss:$8 sps:$4 sm:$0xff]  }
  0xef   :  { %2269 = vmatprep.subr.bf16.mxu0 %v2473_v6  ;;  %v2462_v6 = vld [vmem:[#allocation7 + $0x1f0] ss:$8 sps:$4 sm:$0xff]  }
  0xf2   :  { %2270 = vmatpush3.bf16.msra.mxu0 %v2474_v7 }
  0xf3   :  { %2271 = vmatprep.subr.bf16.mxu0 %v2475_v8 }
  0xf6   :  { %2272 = vmatpush3.bf16.msra.mxu0 %v2476_v9  ;;  %v2477_v9 = vld [vmem:[%s3363_s7 + $0x70] sm:$0xff]  }
  0xf7   :  { %2273 = vmatprep.subr.bf16.mxu0 %v2477_v9  ;;  %v2523_v9 = vld [vmem:[#allocation17 + $0x60] ss:$8 sps:$4 sm:$0xff]  }
  0xfa   :  { %2274 = vmatpush3.bf16.msra.mxu0 %v2478_v10  ;;  %v2528_v10 = vld [vmem:[#allocation17 + $0x74] ss:$8 sps:$4 sm:$0xff]  }
 0x1ad   :  { %v255_v16 = vpop.f32.mrb[0].mxu0 }
 0x1ae   :  { %v256_v17 = vadd.f32 %v2054_v15, %v255_v16  ;;  %v2309_v18 = vpop.f32.mrb[1].mxu0  ;;  %v3249_v15 = vsub.s32 1, %v3241_v11  ;;  %v283_v16 = vrot.slane %v3246_v13, %v3244_v12 }
 0x1af   :  { %v258_v19 = vpop.f32.mrb[2].mxu0 }
 0x1b0   :  { %v261_v21 = vpack.c.bf16 %v256_v17, %v256_v17  ;;  %v2310_v22 = vpop.f32.mrb[3].mxu0  ;;  %v287_v17 = vrot.slane %v3246_v13, %v3249_v15 }
 0x1b2   :  { %2073 = vmatmul.mubr.msk.bf16.vlgmr.msra.gmra.mrb[0].mxu1 %vm380_vm2, %v261_v21 }
 0x1b3   :  { %426 = vmatpush1.bf16.msra.mxu1 %v2357_v20  ;;  %457 = vmatprep.mubr.bf16.mxu1 %v2890_v14 }
 0x1b4   :  { %427 = vmatprep.subr.bf16.mxu1 %v2362_v23 }
 0x1b7   :  { %428 = vmatpush1.bf16.msra.mxu1 %v2360_v24 }
 0x1b8   :  { %429 = vmatprep.subr.bf16.mxu1 %v2365_v25 }
 0x1bb   :  { %430 = vmatpush1.bf16.msra.mxu1 %v2363_v26 }
 0x1bc   :  { %431 = vmatprep.subr.bf16.mxu1 %v2368_v27  ;;  %v2417_v27 = vld [vmem:[#allocation7 + $0x100] ss:$8 sps:$4 sm:$0xff]  }
 0x1bf   :  { %432 = vmatpush1.bf16.msra.mxu1 %v2366_v28 }
 0x1c0   :  { %870 = vmatprep.subr.bf16.mxu1 %v2371_v29  ;;  %v2422_v29 = vld [vmem:[#allocation7 + $0x114] ss:$8 sps:$4 sm:$0xff]  }
 0x1c2   :  { %2074 = vmatmul.mubr.msk.bf16.vlgmr.msra.gmra.mrb[4].mxu1 %vm380_vm2, %v261_v21 }
 0x1c3   :  { %871 = vmatpush1.bf16.msra.mxu1 %v2369_v30  ;;  %v2420_v30 = vld [vmem:[#allocation7 + $0x110] ss:$8 sps:$4 sm:$0xff]  }
 0x1c4   :  { %872 = vmatprep.subr.bf16.mxu1 %v2374_v31  ;;  %v294_v31 = vsub.s32 3, %v3241_v11  ;;  %v2613_v11 = vld [vmem:[%s3371_s15 + $0x70] sm:$0xff]  }
 0x1c7   :  { %873 = vmatpush1.bf16.msra.mxu1 %v2372_v32  ;;  %v2425_v32 = vld [vmem:[#allocation7 + $0x124] ss:$8 sps:$4 sm:$0xff]  }
 0x1c8   :  { %874 = vmatprep.subr.bf16.mxu1 %v2377_v33  ;;  %v295_v33 = vrot.slane %v3246_v13, %v294_v31  ;;  %v2479_v13 = vld [vmem:[%s3363_s7 + $0x78] sm:$0xff]  }
 0x1c9   :  { %2275 = vmatprep.subr.bf16.mxu0 %v2479_v13  ;;  %v2526_v13 = vld [vmem:[#allocation17 + $0x70] ss:$8 sps:$4 sm:$0xff]  }
 0x1cb   :  { %875 = vmatpush1.bf16.msra.mxu1 %v2375_v34  ;;  %v2423_v34 = vld [vmem:[#allocation7 + $0x120] ss:$8 sps:$4 sm:$0xff]  }
 0x1cc   :  { %876 = vmatprep.subr.bf16.mxu1 %v2380_v35  ;;  %v2428_v35 = vld [vmem:[#allocation7 + $0x134] ss:$8 sps:$4 sm:$0xff]  }
 0x1cf   :  { %877 = vmatpush1.bf16.msra.mxu1 %v2378_v36 }
 0x1d0   :  { %878 = vmatprep.subr.bf16.mxu1 %v2383_v37 }
 0x1d3   :  { %879 = vmatpush1.bf16.msra.mxu1 %v2381_v38 }
 0x1d4   :  { %880 = vmatprep.subr.bf16.mxu1 %v2386_v39 }
 0x1d7   :  { %881 = vmatpush1.bf16.msra.mxu1 %v2384_v40  ;;  %v2426_v40 = vld [vmem:[#allocation7 + $0x130] ss:$8 sps:$4 sm:$0xff]  }
 0x1d8   :  { %882 = vmatprep.subr.bf16.mxu1 %v2389_v41 }
 0x1db   :  { %883 = vmatpush1.bf16.msra.mxu1 %v2387_v42  ;;  %v2431_v42 = vld [vmem:[#allocation7 + $0x144] ss:$8 sps:$4 sm:$0xff]  }
 0x1dc   :  { %884 = vmatprep.subr.bf16.mxu1 %v2392_v43 }
 0x1df   :  { %885 = vmatpush1.bf16.msra.mxu1 %v2390_v44 }
 0x1e0   :  { %886 = vmatprep.subr.bf16.mxu1 %v2395_v45  ;;  %v2429_v45 = vld [vmem:[#allocation7 + $0x140] ss:$8 sps:$4 sm:$0xff]  }
 0x1e3   :  { %887 = vmatpush1.bf16.msra.mxu1 %v2393_v46  ;;  %v2434_v46 = vld [vmem:[#allocation7 + $0x154] ss:$8 sps:$4 sm:$0xff]  }
 0x1e4   :  { %888 = vmatprep.subr.bf16.mxu1 %v2398_v47  ;;  %v2432_v47 = vld [vmem:[#allocation7 + $0x150] ss:$8 sps:$4 sm:$0xff]  }
 0x1e7   :  { %889 = vmatpush1.bf16.msra.mxu1 %v2396_v48  ;;  %v2437_v48 = vld [vmem:[#allocation7 + $0x164] ss:$8 sps:$4 sm:$0xff]  }
 0x1e8   :  { %890 = vmatprep.subr.bf16.mxu1 %v2401_v49  ;;  %v2435_v49 = vld [vmem:[#allocation7 + $0x160] ss:$8 sps:$4 sm:$0xff]  }
 0x1eb   :  { %891 = vmatpush1.bf16.msra.mxu1 %v2399_v50  ;;  %v2440_v50 = vld [vmem:[#allocation7 + $0x174] ss:$8 sps:$4 sm:$0xff]  }
 0x1ec   :  { %892 = vmatprep.subr.bf16.mxu1 %v2404_v51  ;;  %v2438_v51 = vld [vmem:[#allocation7 + $0x170] ss:$8 sps:$4 sm:$0xff]  }
 0x1ef   :  { %893 = vmatpush1.bf16.msra.mxu1 %v2402_v52  ;;  %v2443_v52 = vld [vmem:[#allocation7 + $0x184] ss:$8 sps:$4 sm:$0xff]  }
 0x1f0   :  { %894 = vmatprep.subr.bf16.mxu1 %v2407_v53  ;;  %v2441_v53 = vld [vmem:[#allocation7 + $0x180] ss:$8 sps:$4 sm:$0xff]  }
 0x1f3   :  { %895 = vmatpush1.bf16.msra.mxu1 %v2405_v54  ;;  %v2446_v54 = vld [vmem:[#allocation7 + $0x194] ss:$8 sps:$4 sm:$0xff]  }
 0x1f4   :  { %896 = vmatprep.subr.bf16.mxu1 %v2410_v55  ;;  %v2444_v55 = vld [vmem:[#allocation7 + $0x190] ss:$8 sps:$4 sm:$0xff]  }
 0x1f7   :  { %897 = vmatpush1.bf16.msra.mxu1 %v2408_v56  ;;  %v2449_v56 = vld [vmem:[#allocation7 + $0x1a4] ss:$8 sps:$4 sm:$0xff]  }
 0x1f8   :  { %898 = vmatprep.subr.bf16.mxu1 %v2413_v57  ;;  %v2447_v57 = vld [vmem:[#allocation7 + $0x1a0] ss:$8 sps:$4 sm:$0xff]  }
 0x1fb   :  { %899 = vmatpush1.bf16.msra.mxu1 %v2411_v58  ;;  %v2452_v58 = vld [vmem:[#allocation7 + $0x1b4] ss:$8 sps:$4 sm:$0xff]  }
 0x1fc   :  { %900 = vmatprep.subr.bf16.mxu1 %v2416_v59  ;;  %v2450_v59 = vld [vmem:[#allocation7 + $0x1b0] ss:$8 sps:$4 sm:$0xff]  }
 0x1ff   :  { %901 = vmatpush1.bf16.msra.mxu1 %v2414_v60  ;;  %v2455_v60 = vld [vmem:[#allocation7 + $0x1c4] ss:$8 sps:$4 sm:$0xff]  }
 0x200   :  { %911 = vmatprep.subr.bf16.mxu1 %v2419_v61  ;;  %v2453_v61 = vld [vmem:[#allocation7 + $0x1c0] ss:$8 sps:$4 sm:$0xff]  }
 0x285   :  { %v418_v18 = vpop.f32.mrb[0].mxu1 }
 0x286   :  { %v419_v19 = vadd.f32 %v418_v18, %v283_v16  ;;  %v420_v20 = vpop.f32.mrb[1].mxu1  ;;  %v2480_v16 = vld [vmem:[%s3363_s7 + $0x38] sm:$0xff]   ;;  %v538_v18 = vld [vmem:[#allocation8] sm:$0x3] }
 0x287   :  { %v421_v21 = vadd.f32 %v420_v20, %v287_v17  ;;  %v422_v22 = vpop.f32.mrb[2].mxu1  ;;  %2276 = vmatpush3.bf16.msra.mxu0 %v2480_v16  ;;  %v2483_v17 = vld [vmem:[#allocation14 + $0x4] ss:$16 sps:$4 sm:$0xff]   ;;  %v547_v20 = vrot.slane %v538_v18, %v3249_v15  ;;  %v2531_v16 = vld [vmem:[#allocation17 + $0x84] ss:$8 sps:$4 sm:$0xff]  }
 0x288   :  { %v466_v23 = vmax.f32 %v419_v19, 0.0  ;;  %v423_v24 = vpop.f32.mrb[3].mxu1  ;;  %1270 = vmatprep.subr.bf16.mxu0 %v2483_v17  ;;  %v543_v19 = vrot.slane %v538_v18, %v3244_v12  ;;  %v2529_v17 = vld [vmem:[#allocation17 + $0x80] ss:$8 sps:$4 sm:$0xff]   ;;  %v2534_v18 = vld [vmem:[#allocation17 + $0x94] ss:$8 sps:$4 sm:$0xff]  }
 0x289   :  { %v467_v25 = vmax.f32 %v421_v21, 0.0 }
 0x28a   :  { %v470_v28 = vpack.c.bf16 %v466_v23, %v466_v23 }
 0x28b   :  { %v471_v26 = vpack.c.bf16 %v467_v25, %v467_v25 }
 0x28d   :  { %902 = vmatprep.mubr.bf16.mxu1 %v471_v26 }
 0x28e   :  { %903 = vmatmul.mubr.bf16.vlgmr.msra.gmra.mrb[8].mxu1 %v470_v28 }
 0x28f   :  { %912 = vmatpush1.bf16.msra.mxu1 %v2417_v27 }
 0x290   :  { %913 = vmatprep.subr.bf16.mxu1 %v2422_v29 }
 0x293   :  { %914 = vmatpush1.bf16.msra.mxu1 %v2420_v30  ;;  %v2481_v30 = vld [vmem:[#allocation14] ss:$16 sps:$4 sm:$0xff]  }
 0x294   :  { %915 = vmatprep.subr.bf16.mxu1 %v2425_v32 }
 0x295   :  { %v459_v36 = vpop.f32.mrb[4].mxu1 }
 0x296   :  { %v461_v37 = vpop.f32.mrb[5].mxu1  ;;  %v460_v4 = vadd.f32 %v459_v36, %v291_v1  ;;  %v2487_v36 = vld [vmem:[#allocation14 + $0x40] ss:$16 sps:$4 sm:$0xff]   ;;  %v2511_v1 = vld [vmem:[#allocation17 + $0x20] ss:$8 sps:$4 sm:$0xff]  }
 0x297   :  { %v462_v38 = vadd.f32 %v461_v37, %v295_v33  ;;  %v463_v39 = vpop.f32.mrb[6].mxu1  ;;  %916 = vmatpush1.bf16.msra.mxu1 %v2423_v34  ;;  %v2486_v33 = vld [vmem:[#allocation14 + $0x24] ss:$16 sps:$4 sm:$0xff]   ;;  %v2484_v34 = vld [vmem:[#allocation14 + $0x20] ss:$16 sps:$4 sm:$0xff]  }
 0x298   :  { %v464_v41 = vpop.f32.mrb[7].mxu1  ;;  %917 = vmatprep.subr.bf16.mxu1 %v2428_v35  ;;  %v468_v7 = vmax.f32 %v460_v4, 0.0  ;;  %v2489_v35 = vld [vmem:[#allocation14 + $0x44] ss:$16 sps:$4 sm:$0xff]   ;;  %v2495_v39 = vld [vmem:[#allocation14 + $0xc] ss:$16 sps:$4 sm:$0xff]  }
 0x299   :  { %v469_v43 = vmax.f32 %v462_v38, 0.0  ;;  %v2492_v37 = vld [vmem:[#allocation14 + $0x64] ss:$16 sps:$4 sm:$0xff]   ;;  %v2490_v38 = vld [vmem:[#allocation14 + $0x60] ss:$16 sps:$4 sm:$0xff]  }
 0x29a   :  { %v472_v8 = vpack.c.bf16 %v468_v7, %v468_v7  ;;  %v2139_v41 = vld [vmem:[#allocation10] ss:$0 sm:$0xff]  ;;  %v2519_v4 = vld [vmem:[#allocation17 + $0x44] ss:$8 sps:$4 sm:$0xff]   ;;  %v2520_v7 = vld [vmem:[#allocation17 + $0x50] ss:$8 sps:$4 sm:$0xff]  }
 0x29b   :  { %v473_v44 = vpack.c.bf16 %v469_v43, %v469_v43  ;;  %918 = vmatpush1.bf16.msra.mxu1 %v2426_v40 }
 0x29c   :  { %919 = vmatprep.subr.bf16.mxu1 %v2431_v42 }
 0x29d   :  { %943 = vmatprep.mubr.bf16.mxu1 %v473_v44 }
 0x29f   :  { %920 = vmatpush1.bf16.msra.mxu1 %v2429_v45 }
 0x2a0   :  { %921 = vmatprep.subr.bf16.mxu1 %v2434_v46 }
 0x2a3   :  { %922 = vmatpush1.bf16.msra.mxu1 %v2432_v47  ;;  %v2156_v47 = vld [vmem:[#allocation11] ss:$0 sm:$0xff] }
 0x2a4   :  { %923 = vmatprep.subr.bf16.mxu1 %v2437_v48 }
 0x2a7   :  { %924 = vmatpush1.bf16.msra.mxu1 %v2435_v49  ;;  %v2157_v49 = vld [vmem:[#allocation13] ss:$0 sm:$0xff] }
 0x2a8   :  { %925 = vmatprep.subr.bf16.mxu1 %v2440_v50 }
 0x2ab   :  { %926 = vmatpush1.bf16.msra.mxu1 %v2438_v51 }
 0x2ac   :  { %927 = vmatprep.subr.bf16.mxu1 %v2443_v52  ;;  %v2493_v52 = vld [vmem:[#allocation14 + $0x8] ss:$16 sps:$4 sm:$0xff]  }
 0x2af   :  { %928 = vmatpush1.bf16.msra.mxu1 %v2441_v53 }
 0x2b0   :  { %929 = vmatprep.subr.bf16.mxu1 %v2446_v54  ;;  %v2498_v54 = vld [vmem:[#allocation14 + $0x2c] ss:$16 sps:$4 sm:$0xff]  }
 0x2b3   :  { %930 = vmatpush1.bf16.msra.mxu1 %v2444_v55  ;;  %v2496_v55 = vld [vmem:[#allocation14 + $0x28] ss:$16 sps:$4 sm:$0xff]  }
 0x2b4   :  { %931 = vmatprep.subr.bf16.mxu1 %v2449_v56  ;;  %v2501_v56 = vld [vmem:[#allocation14 + $0x4c] ss:$16 sps:$4 sm:$0xff]  }
 0x2b7   :  { %932 = vmatpush1.bf16.msra.mxu1 %v2447_v57  ;;  %v2499_v57 = vld [vmem:[#allocation14 + $0x48] ss:$16 sps:$4 sm:$0xff]  }
 0x2b8   :  { %933 = vmatprep.subr.bf16.mxu1 %v2452_v58  ;;  %v2504_v58 = vld [vmem:[#allocation14 + $0x6c] ss:$16 sps:$4 sm:$0xff]  }
 0x2bb   :  { %934 = vmatpush1.bf16.msra.mxu1 %v2450_v59  ;;  %v2502_v59 = vld [vmem:[#allocation14 + $0x68] ss:$16 sps:$4 sm:$0xff]  }
 0x2bc   :  { %935 = vmatprep.subr.bf16.mxu1 %v2455_v60  ;;  %v2507_v60 = vld [vmem:[#allocation17 + $0x4] ss:$8 sps:$4 sm:$0xff]  }
 0x2bf   :  { %936 = vmatpush1.bf16.msra.mxu1 %v2453_v61  ;;  %v2505_v61 = vld [vmem:[#allocation17] ss:$8 sps:$4 sm:$0xff]  }
 0x2c0   :  { %937 = vmatprep.subr.bf16.mxu1 %v2458_v63  ;;  %v2510_v63 = vld [vmem:[#allocation17 + $0x14] ss:$8 sps:$4 sm:$0xff]  }
 0x2c3   :  { %938 = vmatpush1.bf16.msra.mxu1 %v2456_v0  ;;  %v2508_v0 = vld [vmem:[#allocation17 + $0x10] ss:$8 sps:$4 sm:$0xff]  }
 0x2c4   :  { %939 = vmatprep.subr.bf16.mxu1 %v2461_v2  ;;  %v2516_v2 = vld [vmem:[#allocation17 + $0x34] ss:$8 sps:$4 sm:$0xff]  }
 0x2c7   :  { %940 = vmatpush1.bf16.msra.mxu1 %v2459_v3  ;;  %v2514_v3 = vld [vmem:[#allocation17 + $0x30] ss:$8 sps:$4 sm:$0xff]  }
 0x2c8   :  { %941 = vmatprep.subr.bf16.mxu1 %v2464_v5  ;;  %v2517_v5 = vld [vmem:[#allocation17 + $0x40] ss:$8 sps:$4 sm:$0xff]  }
 0x2cb   :  { %942 = vmatpush1.bf16.msra.mxu1 %v2462_v6  ;;  %v2522_v6 = vld [vmem:[#allocation17 + $0x54] ss:$8 sps:$4 sm:$0xff]  }
 0x2ce   :  { %944 = vmatmul.mubr.bf16.vlgmr.msra.gmra.mrb[8].mxu1 %v472_v8  ;;  %v2525_v8 = vld [vmem:[#allocation17 + $0x64] ss:$8 sps:$4 sm:$0xff]  }
 0x3a1   :  { %v945_v21 = vpop.f32.mrb[8].mxu1 }
 0x3a2   :  { %v2311_v22 = vadd.f32 %v945_v21, %v543_v19  ;;  %v947_v23 = vpop.f32.mrb[9].mxu1  ;;  %v2532_v19 = vld [vmem:[#allocation17 + $0x90] ss:$8 sps:$4 sm:$0xff]   ;;  %v2535_v21 = vld [vmem:[#allocation17 + $0xa0] ss:$8 sps:$4 sm:$0xff]  }
 0x3a3   :  { %v2312_v24 = vadd.f32 %v947_v23, %v547_v20  ;;  %v949_v25 = vpop.f32.mrb[10].mxu1  ;;  %v2537_v20 = vld [vmem:[#allocation17 + $0xa4] ss:$8 sps:$4 sm:$0xff]   ;;  %v2538_v23 = vld [vmem:[#allocation17 + $0xb0] ss:$8 sps:$4 sm:$0xff]  }
 0x3a4   :  { %v952_v26 = vmax.f32 %v2311_v22, 0.0  ;;  %v950_v27 = vpop.f32.mrb[11].mxu1  ;;  %v2540_v22 = vld [vmem:[#allocation17 + $0xb4] ss:$8 sps:$4 sm:$0xff]   ;;  %v2541_v25 = vld [vmem:[#allocation17 + $0xc0] ss:$8 sps:$4 sm:$0xff]  }
 0x3a5   :  { %v953_v28 = vmax.f32 %v2312_v24, 0.0  ;;  %v2543_v24 = vld [vmem:[#allocation17 + $0xc4] ss:$8 sps:$4 sm:$0xff]   ;;  %v2544_v27 = vld [vmem:[#allocation17 + $0xd0] ss:$8 sps:$4 sm:$0xff]  }
 0x3a6   :  { %v954_v32 = vpack.c.bf16 %v952_v26, %v952_v26  ;;  %v2546_v26 = vld [vmem:[#allocation17 + $0xd4] ss:$8 sps:$4 sm:$0xff]  }
 0x3a7   :  { %v955_v29 = vpack.c.bf16 %v953_v28, %v953_v28  ;;  %v2549_v28 = vld [vmem:[#allocation17 + $0xe4] ss:$8 sps:$4 sm:$0xff]  }
 0x3a9   :  { %1123 = vmatprep.mubr.bf16.mxu0 %v955_v29  ;;  %v2547_v29 = vld [vmem:[#allocation17 + $0xe0] ss:$8 sps:$4 sm:$0xff]  }
 0x3aa   :  { %1124 = vmatmul.mubr.bf16.vlgmr.msra.gmra.mrb[4].mxu0 %v954_v32  ;;  %v2550_v32 = vld [vmem:[#allocation17 + $0xf0] ss:$8 sps:$4 sm:$0xff]  }
 0x3ab   :  { %1271 = vmatpush1.bf16.msra.mxu0 %v2481_v30  ;;  %1302 = vmatprep.mubr.bf16.mxu0 %v2890_v14  ;;  %v2552_v30 = vld [vmem:[#allocation17 + $0xf4] ss:$8 sps:$4 sm:$0xff]  }
 0x3ac   :  { %1272 = vmatprep.subr.bf16.mxu0 %v2486_v33  ;;  %v2555_v33 = vld [vmem:[#allocation17 + $0x104] ss:$8 sps:$4 sm:$0xff]  }
 0x3af   :  { %1273 = vmatpush1.bf16.msra.mxu0 %v2484_v34  ;;  %v2601_v34 = vld [vmem:[%s3371_s15 + $0x40] sm:$0xff]  }
 0x3b0   :  { %1274 = vmatprep.subr.bf16.mxu0 %v2489_v35  ;;  %v2602_v35 = vld [vmem:[%s3371_s15] sm:$0xff]   ;;  %2283 = vmatprep.subr.bf16.mxu1 %v2601_v34 }
 0x3b1   :  { %2284 = vmatpush3.bf16.msra.mxu1 %v2602_v35  ;;  %v2597_v35 = vld [vmem:[#allocation17 + $0x1e4] ss:$8 sps:$4 sm:$0xff]  }
 0x3b3   :  { %1275 = vmatpush1.bf16.msra.mxu0 %v2487_v36  ;;  %v2603_v36 = vld [vmem:[%s3371_s15 + $0x48] sm:$0xff]  }
 0x3b4   :  { %1276 = vmatprep.subr.bf16.mxu0 %v2492_v37  ;;  %v2604_v37 = vld [vmem:[%s3371_s15 + $0x8] sm:$0xff]   ;;  %2285 = vmatprep.subr.bf16.mxu1 %v2603_v36  ;;  %v2595_v36 = vld [vmem:[#allocation17 + $0x1e0] ss:$8 sps:$4 sm:$0xff]  }
 0x3b5   :  { %2286 = vmatpush3.bf16.msra.mxu1 %v2604_v37 }
 0x3b7   :  { %1277 = vmatpush1.bf16.msra.mxu0 %v2490_v38  ;;  %v2605_v38 = vld [vmem:[%s3371_s15 + $0x50] sm:$0xff]  }
 0x3b8   :  { %1311 = vmatprep.subr.bf16.mxu0 %v2495_v39  ;;  %v2606_v39 = vld [vmem:[%s3371_s15 + $0x10] sm:$0xff]   ;;  %2287 = vmatprep.subr.bf16.mxu1 %v2605_v38 }
 0x3b9   :  { %2288 = vmatpush3.bf16.msra.mxu1 %v2606_v39  ;;  %v2600_v38 = vld [vmem:[#allocation17 + $0x1f4] ss:$8 sps:$4 sm:$0xff]   ;;  %v2598_v39 = vld [vmem:[#allocation17 + $0x1f0] ss:$8 sps:$4 sm:$0xff]  }
 0x47d   :  { %v2277_v40 = vpop.f32.mrb[4].mxu0 }
 0x47e   :  { %v2278_v42 = vpop.f32.mrb[5].mxu0 }
 0x47f   :  { %v2279_v43 = vadd.f32 %v2278_v42, %v2277_v40  ;;  %v2280_v44 = vpop.f32.mrb[6].mxu0  ;;  %v2607_v40 = vld [vmem:[%s3371_s15 + $0x58] sm:$0xff]   ;;  %v2609_v42 = vld [vmem:[%s3371_s15 + $0x60] sm:$0xff]  }
 0x480   :  { %v2281_v45 = vpop.f32.mrb[7].mxu0  ;;  %2289 = vmatprep.subr.bf16.mxu1 %v2607_v40  ;;  %v2611_v44 = vld [vmem:[%s3371_s15 + $0x68] sm:$0xff]  }
 0x481   :  { %v1126_v46 = vadd.f32 %v2279_v43, %v2139_v41  ;;  %v2608_v41 = vld [vmem:[%s3371_s15 + $0x18] sm:$0xff]   ;;  %v2610_v43 = vld [vmem:[%s3371_s15 + $0x20] sm:$0xff]   ;;  %v2612_v45 = vld [vmem:[%s3371_s15 + $0x28] sm:$0xff]  }
 0x482   :  { %2290 = vmatpush3.bf16.msra.mxu1 %v2608_v41 }
 0x483   :  { %v1131_v48 = vmax.f32 %v1126_v46, 0.0  ;;  %2291 = vmatprep.subr.bf16.mxu1 %v2609_v42  ;;  %v3321_v46 = vld [vmem:[#allocation16] sm:$0xf] }
 0x484   :  { %v1178_v34 = vrot.slane %v3321_v46, %v290_v62  ;;  %v2614_v62 = vld [vmem:[%s3371_s15 + $0x30] sm:$0xff]   ;;  %v2615_v42 = vld [vmem:[%s3371_s15 + $0x78] sm:$0xff]  }
 0x485   :  { %v1139_v50 = vmul.f32 %v2156_v47, %v1131_v48  ;;  %v1170_v47 = vrot.slane %v3321_v46, %v3244_v12  ;;  %v1174_v48 = vrot.slane %v3321_v46, %v3249_v15 }
 0x486   :  { %2292 = vmatpush3.bf16.msra.mxu1 %v2610_v43  ;;  %v2616_v43 = vld [vmem:[%s3371_s15 + $0x38] sm:$0xff]  }
 0x487   :  { %v1147_v51 = vadd.f32 %v2157_v49, %v1139_v50  ;;  %2293 = vmatprep.subr.bf16.mxu1 %v2611_v44  ;;  %v1424_v44 = vld [vmem:[#allocation19] sm:$0x3] }
 0x489   :  { %v1148_v53 = vpack.c.bf16 %v1147_v51, %v1147_v51  ;;  %2036 = vst.msk [vmem:[%s3375_s19] sm:$0xff] %vm380_vm2, %v1147_v51 }
 0x48a   :  { %2294 = vmatpush3.bf16.msra.mxu1 %v2612_v45  ;;  %v1429_v45 = vrot.slane %v1424_v44, %v3244_v12  ;;  %v2240_v12 = vld [vmem:[%s3372_s16] ss:$0 sm:$0xff] }
 0x48b   :  { %2174 = vmatmul.mubr.msk.bf16.vlgmr.msra.gmra.mrb[8].mxu0 %vm380_vm2, %v1148_v53  ;;  %2295 = vmatprep.subr.bf16.mxu1 %v2613_v11 }
 0x48c   :  { %1312 = vmatpush1.bf16.msra.mxu0 %v2493_v52  ;;  %1343 = vmatprep.mubr.bf16.mxu0 %v2890_v14  ;;  %v2513_v14 = vld [vmem:[#allocation17 + $0x24] ss:$8 sps:$4 sm:$0xff]  }
 0x48d   :  { %1313 = vmatprep.subr.bf16.mxu0 %v2498_v54 }
 0x48e   :  { %2296 = vmatpush3.bf16.msra.mxu1 %v2614_v62 }
 0x48f   :  { %2297 = vmatprep.subr.bf16.mxu1 %v2615_v42 }
 0x490   :  { %1314 = vmatpush1.bf16.msra.mxu0 %v2496_v55 }
 0x491   :  { %1315 = vmatprep.subr.bf16.mxu0 %v2501_v56 }
 0x492   :  { %2298 = vmatpush3.bf16.msra.mxu1 %v2616_v43 }
 0x494   :  { %1316 = vmatpush1.bf16.msra.mxu0 %v2499_v57 }
 0x495   :  { %1317 = vmatprep.subr.bf16.mxu0 %v2504_v58  ;;  %v2553_v58 = vld [vmem:[#allocation17 + $0x100] ss:$8 sps:$4 sm:$0xff]  }
 0x498   :  { %1318 = vmatpush1.bf16.msra.mxu0 %v2502_v59 }
 0x499   :  { %1756 = vmatprep.subr.bf16.mxu0 %v2507_v60  ;;  %v2558_v60 = vld [vmem:[#allocation17 + $0x114] ss:$8 sps:$4 sm:$0xff]  }
 0x49b   :  { %2175 = vmatmul.mubr.msk.bf16.vlgmr.msra.gmra.mrb[12].mxu0 %vm380_vm2, %v1148_v53 }
 0x49c   :  { %1757 = vmatpush1.bf16.msra.mxu0 %v2505_v61  ;;  %v2556_v61 = vld [vmem:[#allocation17 + $0x110] ss:$8 sps:$4 sm:$0xff]  }
 0x49d   :  { %1758 = vmatprep.subr.bf16.mxu0 %v2510_v63  ;;  %v2561_v63 = vld [vmem:[#allocation17 + $0x124] ss:$8 sps:$4 sm:$0xff]  }
 0x4a0   :  { %1759 = vmatpush1.bf16.msra.mxu0 %v2508_v0  ;;  %v1182_v0 = vrot.slane %v3321_v46, %v294_v31  ;;  %v2568_v31 = vld [vmem:[#allocation17 + $0x150] ss:$8 sps:$4 sm:$0xff]   ;;  %v1433_v46 = vrot.slane %v1424_v44, %v3249_v15 }
 0x4a1   :  { %1760 = vmatprep.subr.bf16.mxu0 %v2513_v14  ;;  %v2559_v14 = vld [vmem:[#allocation17 + $0x120] ss:$8 sps:$4 sm:$0xff]  }
 0x4a4   :  { %1761 = vmatpush1.bf16.msra.mxu0 %v2511_v1  ;;  %v2564_v1 = vld [vmem:[#allocation17 + $0x134] ss:$8 sps:$4 sm:$0xff]  }
 0x4a5   :  { %1762 = vmatprep.subr.bf16.mxu0 %v2516_v2 }
 0x4a8   :  { %1763 = vmatpush1.bf16.msra.mxu0 %v2514_v3 }
 0x4a9   :  { %1764 = vmatprep.subr.bf16.mxu0 %v2519_v4 }
 0x4ac   :  { %1765 = vmatpush1.bf16.msra.mxu0 %v2517_v5 }
 0x4ad   :  { %1766 = vmatprep.subr.bf16.mxu0 %v2522_v6  ;;  %v2562_v6 = vld [vmem:[#allocation17 + $0x130] ss:$8 sps:$4 sm:$0xff]  }
 0x4b0   :  { %1767 = vmatpush1.bf16.msra.mxu0 %v2520_v7 }
 0x4b1   :  { %1768 = vmatprep.subr.bf16.mxu0 %v2525_v8  ;;  %v2567_v8 = vld [vmem:[#allocation17 + $0x144] ss:$8 sps:$4 sm:$0xff]  }
 0x4b4   :  { %1769 = vmatpush1.bf16.msra.mxu0 %v2523_v9 }
 0x4b5   :  { %1770 = vmatprep.subr.bf16.mxu0 %v2528_v10 }
 0x4b8   :  { %1771 = vmatpush1.bf16.msra.mxu0 %v2526_v13  ;;  %v2565_v13 = vld [vmem:[#allocation17 + $0x140] ss:$8 sps:$4 sm:$0xff]  }
 0x4b9   :  { %1772 = vmatprep.subr.bf16.mxu0 %v2531_v16  ;;  %v2570_v16 = vld [vmem:[#allocation17 + $0x154] ss:$8 sps:$4 sm:$0xff]  }
 0x4bc   :  { %1773 = vmatpush1.bf16.msra.mxu0 %v2529_v17  ;;  %v2573_v17 = vld [vmem:[#allocation17 + $0x164] ss:$8 sps:$4 sm:$0xff]  }
 0x4bd   :  { %1774 = vmatprep.subr.bf16.mxu0 %v2534_v18  ;;  %v2571_v18 = vld [vmem:[#allocation17 + $0x160] ss:$8 sps:$4 sm:$0xff]  }
 0x4c0   :  { %1775 = vmatpush1.bf16.msra.mxu0 %v2532_v19  ;;  %v2576_v19 = vld [vmem:[#allocation17 + $0x174] ss:$8 sps:$4 sm:$0xff]  }
 0x4c1   :  { %1776 = vmatprep.subr.bf16.mxu0 %v2537_v20  ;;  %v2574_v20 = vld [vmem:[#allocation17 + $0x170] ss:$8 sps:$4 sm:$0xff]  }
 0x4c4   :  { %1777 = vmatpush1.bf16.msra.mxu0 %v2535_v21  ;;  %v2579_v21 = vld [vmem:[#allocation17 + $0x184] ss:$8 sps:$4 sm:$0xff]  }
 0x4c5   :  { %1778 = vmatprep.subr.bf16.mxu0 %v2540_v22  ;;  %v2577_v22 = vld [vmem:[#allocation17 + $0x180] ss:$8 sps:$4 sm:$0xff]  }
 0x4c8   :  { %1779 = vmatpush1.bf16.msra.mxu0 %v2538_v23  ;;  %v2582_v23 = vld [vmem:[#allocation17 + $0x194] ss:$8 sps:$4 sm:$0xff]  }
 0x4c9   :  { %1780 = vmatprep.subr.bf16.mxu0 %v2543_v24  ;;  %v2580_v24 = vld [vmem:[#allocation17 + $0x190] ss:$8 sps:$4 sm:$0xff]  }
 0x4cc   :  { %1781 = vmatpush1.bf16.msra.mxu0 %v2541_v25  ;;  %v2585_v25 = vld [vmem:[#allocation17 + $0x1a4] ss:$8 sps:$4 sm:$0xff]  }
 0x4cd   :  { %1782 = vmatprep.subr.bf16.mxu0 %v2546_v26  ;;  %v2583_v26 = vld [vmem:[#allocation17 + $0x1a0] ss:$8 sps:$4 sm:$0xff]  }
 0x4d0   :  { %1783 = vmatpush1.bf16.msra.mxu0 %v2544_v27  ;;  %v2588_v27 = vld [vmem:[#allocation17 + $0x1b4] ss:$8 sps:$4 sm:$0xff]  }
 0x4d1   :  { %1784 = vmatprep.subr.bf16.mxu0 %v2549_v28  ;;  %v2586_v28 = vld [vmem:[#allocation17 + $0x1b0] ss:$8 sps:$4 sm:$0xff]  }
 0x4d4   :  { %1785 = vmatpush1.bf16.msra.mxu0 %v2547_v29  ;;  %v2591_v29 = vld [vmem:[#allocation17 + $0x1c4] ss:$8 sps:$4 sm:$0xff]  }
 0x4d5   :  { %1786 = vmatprep.subr.bf16.mxu0 %v2552_v30  ;;  %v2589_v30 = vld [vmem:[#allocation17 + $0x1c0] ss:$8 sps:$4 sm:$0xff]  }
 0x4d8   :  { %1787 = vmatpush1.bf16.msra.mxu0 %v2550_v32  ;;  %v2594_v32 = vld [vmem:[#allocation17 + $0x1d4] ss:$8 sps:$4 sm:$0xff]  }
 0x4d9   :  { %1797 = vmatprep.subr.bf16.mxu0 %v2555_v33  ;;  %v2592_v33 = vld [vmem:[#allocation17 + $0x1d0] ss:$8 sps:$4 sm:$0xff]  }
 0x55e   :  { %v1304_v49 = vpop.f32.mrb[8].mxu0 }
 0x55f   :  { %v1305_v50 = vadd.f32 %v1304_v49, %v1170_v47  ;;  %v1306_v51 = vpop.f32.mrb[9].mxu0 }
 0x560   :  { %v1307_v52 = vadd.f32 %v1306_v51, %v1174_v48  ;;  %v1308_v53 = vpop.f32.mrb[10].mxu0 }
 0x561   :  { %v1352_v54 = vmax.f32 %v1305_v50, 0.0  ;;  %v1309_v55 = vpop.f32.mrb[11].mxu0 }
 0x562   :  { %v1353_v56 = vmax.f32 %v1307_v52, 0.0 }
 0x563   :  { %v1356_v59 = vpack.c.bf16 %v1352_v54, %v1352_v54 }
 0x564   :  { %v1357_v57 = vpack.c.bf16 %v1353_v56, %v1353_v56 }
 0x566   :  { %1788 = vmatprep.mubr.bf16.mxu0 %v1357_v57 }
 0x567   :  { %1789 = vmatmul.mubr.bf16.vlgmr.msra.gmra.mrb[16].mxu0 %v1356_v59 }
 0x568   :  { %1798 = vmatpush1.bf16.msra.mxu0 %v2553_v58 }
 0x569   :  { %1799 = vmatprep.subr.bf16.mxu0 %v2558_v60 }
 0x56c   :  { %1800 = vmatpush1.bf16.msra.mxu0 %v2556_v61 }
 0x56d   :  { %1801 = vmatprep.subr.bf16.mxu0 %v2561_v63  ;;  %v2257_v63 = vld [vmem:[%s3373_s17] ss:$0 sm:$0xff] }
 0x56e   :  { %v1345_v2 = vpop.f32.mrb[12].mxu0 }
 0x56f   :  { %v1347_v3 = vpop.f32.mrb[13].mxu0  ;;  %v1346_v37 = vadd.f32 %v1345_v2, %v1178_v34 }
 0x570   :  { %v1348_v4 = vadd.f32 %v1347_v3, %v1182_v0  ;;  %v1349_v5 = vpop.f32.mrb[14].mxu0  ;;  %1802 = vmatpush1.bf16.msra.mxu0 %v2559_v14 }
 0x571   :  { %v1350_v7 = vpop.f32.mrb[15].mxu0  ;;  %1803 = vmatprep.subr.bf16.mxu0 %v2564_v1  ;;  %v1354_v40 = vmax.f32 %v1346_v37, 0.0  ;;  %v2258_v1 = vld [vmem:[#allocation2] ss:$0 sm:$0xff] }
 0x572   :  { %v1355_v9 = vmax.f32 %v1348_v4, 0.0 }
 0x573   :  { %v1358_v41 = vpack.c.bf16 %v1354_v40, %v1354_v40 }
 0x574   :  { %v1359_v10 = vpack.c.bf16 %v1355_v9, %v1355_v9  ;;  %1804 = vmatpush1.bf16.msra.mxu0 %v2562_v6 }
 0x575   :  { %1805 = vmatprep.subr.bf16.mxu0 %v2567_v8 }
 0x576   :  { %1829 = vmatprep.mubr.bf16.mxu0 %v1359_v10 }
 0x578   :  { %1806 = vmatpush1.bf16.msra.mxu0 %v2565_v13 }
 0x579   :  { %1807 = vmatprep.subr.bf16.mxu0 %v2570_v16 }
 0x57c   :  { %1808 = vmatpush1.bf16.msra.mxu0 %v2568_v31 }
 0x57d   :  { %1809 = vmatprep.subr.bf16.mxu0 %v2573_v17 }
 0x580   :  { %1810 = vmatpush1.bf16.msra.mxu0 %v2571_v18 }
 0x581   :  { %1811 = vmatprep.subr.bf16.mxu0 %v2576_v19 }
 0x584   :  { %1812 = vmatpush1.bf16.msra.mxu0 %v2574_v20 }
 0x585   :  { %1813 = vmatprep.subr.bf16.mxu0 %v2579_v21 }
 0x588   :  { %1814 = vmatpush1.bf16.msra.mxu0 %v2577_v22 }
 0x589   :  { %1815 = vmatprep.subr.bf16.mxu0 %v2582_v23 }
 0x58c   :  { %1816 = vmatpush1.bf16.msra.mxu0 %v2580_v24 }
 0x58d   :  { %1817 = vmatprep.subr.bf16.mxu0 %v2585_v25 }
 0x590   :  { %1818 = vmatpush1.bf16.msra.mxu0 %v2583_v26 }
 0x591   :  { %1819 = vmatprep.subr.bf16.mxu0 %v2588_v27 }
 0x594   :  { %1820 = vmatpush1.bf16.msra.mxu0 %v2586_v28 }
 0x595   :  { %1821 = vmatprep.subr.bf16.mxu0 %v2591_v29 }
 0x598   :  { %1822 = vmatpush1.bf16.msra.mxu0 %v2589_v30 }
 0x599   :  { %1823 = vmatprep.subr.bf16.mxu0 %v2594_v32 }
 0x59c   :  { %1824 = vmatpush1.bf16.msra.mxu0 %v2592_v33 }
 0x59d   :  { %1825 = vmatprep.subr.bf16.mxu0 %v2597_v35 }
 0x5a0   :  { %1826 = vmatpush1.bf16.msra.mxu0 %v2595_v36 }
 0x5a1   :  { %1827 = vmatprep.subr.bf16.mxu0 %v2600_v38 }
 0x5a4   :  { %1828 = vmatpush1.bf16.msra.mxu0 %v2598_v39 }
 0x5a7   :  { %1830 = vmatmul.mubr.bf16.vlgmr.msra.gmra.mrb[16].mxu0 %v1358_v41 }
 0x67a   :  { %v1831_v47 = vpop.f32.mrb[16].mxu0 }
 0x67b   :  { %v2313_v48 = vadd.f32 %v1831_v47, %v1429_v45  ;;  %v1833_v49 = vpop.f32.mrb[17].mxu0 }
 0x67c   :  { %v2314_v50 = vadd.f32 %v1833_v49, %v1433_v46  ;;  %v1835_v51 = vpop.f32.mrb[18].mxu0 }
 0x67d   :  { %v1838_v52 = vmax.f32 %v2313_v48, 0.0  ;;  %v1836_v53 = vpop.f32.mrb[19].mxu0 }
 0x67e   :  { %v1839_v54 = vmax.f32 %v2314_v50, 0.0 }
 0x67f   :  { %v1840_v56 = vpack.c.bf16 %v1838_v52, %v1838_v52 }
 0x680   :  { %v1841_v55 = vpack.c.bf16 %v1839_v54, %v1839_v54 }
 0x682   :  { %2009 = vmatprep.mubr.bf16.mxu1 %v1841_v55 }
 0x683   :  { %2010 = vmatmul.mubr.bf16.vlgmr.msra.gmra.mrb[12].mxu1 %v1840_v56 }
 0x756   :  { %v2299_v57 = vpop.f32.mrb[12].mxu1 }
 0x757   :  { %v2300_v58 = vpop.f32.mrb[13].mxu1 }
 0x758   :  { %v2301_v59 = vadd.f32 %v2300_v58, %v2299_v57  ;;  %v2302_v15 = vpop.f32.mrb[14].mxu1 }
 0x759   :  { %v2303_v60 = vpop.f32.mrb[15].mxu1 }
 0x75a   :  { %v2012_v61 = vadd.f32 %v2301_v59, %v2240_v12 }
 0x75c   :  { %v2017_v0 = vmax.f32 %v2012_v61, 0.0 }
 0x75e   :  { %v2025_v14 = vmul.f32 %v2257_v63, %v2017_v0 }
 0x760   :  { %2026 = vadd.xlane.f32.xlu0 %v2025_v14 }
 0x7ed   :  { %v2027_v2 = vpop.xlane.xlu0 %2026 }
 0x7ee   :  { %v2035_v3 = vadd.f32 %v2258_v1, %v2027_v2 }
 0x7f0   :  { %2039 = vperm.xlu0 %2343, %v2035_v3  }
 0x86f   :  { %v2040_v4 = vpop.permute.xlu0 %2039 }
 0x870   :  { %2043 = vst.msk [vmem:[%s3375_s19] sm:$0xff] %vm2042_vm3, %v2040_v4 }
 0x871   :  { %2048 = vsyncpa [#allocation4], 1 }
 0x872   :  { %2049 = vsyncpa [#allocation6], 1 }
 0x873   :  { %2050 = vsyncpa [#allocation9], 1 }
 0x874   :  { %2051 = vsyncpa [#allocation12], 1 }
 0x875   :  { %2052 = vsyncpa [#allocation15], 1 }
 0x876   :  { %2053 = vsyncpa [#allocation18], 1 }

</bundles_post_ra>
